<compile_context>
chip_gen: v6e
topology: v6e:2x2x1
jax: 0.10.0
libtpu: 0.0.40
codegen_flags: <defaults>
</compile_context>

<pallas_src>
import functools

import numpy as np
import jax
import jax.numpy as jnp
from jax.experimental import pallas as pl
from jax.experimental.pallas import tpu as pltpu

_SQRT_HALF = 0.7071067811865476


def _erf(x):
    # Abramowitz & Stegun 7.1.26, |abs err| <= 1.5e-7 (nn.GELU() uses exact erf; this
    # is well inside 1e-4).  The divide is an EUP approx-reciprocal + one Newton step,
    # keeping the widest-tensor polynomial off a VALU divide path.
    a1, a2, a3, a4, a5 = (0.254829592, -0.284496736, 1.421413741,
                          -1.453152027, 1.061405429)
    p = 0.3275911
    s = jnp.where(x >= 0.0, 1.0, -1.0)
    z = jnp.abs(x)
    d = 1.0 + p * z
    r = pl.reciprocal(d, approx=True)
    t = r * (2.0 - d * r)                      # one Newton step -> ~f32-exact 1/d
    poly = t * (a1 + t * (a2 + t * (a3 + t * (a4 + t * a5))))
    return s * (1.0 - poly * jnp.exp(-z * z))


def _gelu(x):
    # exact (erf-based) GELU, matching nn.GELU() / F.gelu defaults
    return 0.5 * x * (1.0 + _erf(x * _SQRT_HALF))


def _group_norm1(y, gamma_t, beta_t, eps=1e-5):
    # GroupNorm(num_groups=1) on a lane-dense (Bt, H, W*C) activation.
    # gamma_t/beta_t are per-channel params pre-tiled to (1, W*C) in the wrapper.
    # Single fused sum / sum-of-squares pass, all f32.
    inv_n = 1.0 / float(y.shape[1] * y.shape[2])
    s1 = jnp.sum(y, axis=(1, 2), keepdims=True)
    s2 = jnp.sum(y * y, axis=(1, 2), keepdims=True)
    mean = s1 * inv_n
    var = jnp.maximum(s2 * inv_n - mean * mean, 0.0)
    return (y - mean) * jax.lax.rsqrt(var + eps) * gamma_t + beta_t


def _conv3x3(x, w_ref):
    """3x3 "same" conv as ONE MXU matmul (ky band folded into K).

    x:     (Bt, H, W*Cin) f32, lane-dense (channels minor on lanes).
    w_ref: (3*W*Cin, W*Cout) banded weights, ky-major, already in the matmul dtype.
    """
    bt, h, wc_in = x.shape
    m = bt * h
    x2 = x.reshape(m, wc_in)                      # aligned collapse (H%8==0 or Bt==1)
    # Rows h-1 / h+1 via XLU sublane rotates.  Rolling the flattened Bt*H axis wraps
    # rows across samples, but exactly those wrapped rows are masked to zero below
    # (= the conv's vertical zero padding).
    up = pltpu.roll(x2, shift=1, axis=0)          # row h-1   (ky = 0)
    dn = pltpu.roll(x2, shift=m - 1, axis=0)      # row h+1   (ky = 2)
    row = jax.lax.broadcasted_iota(jnp.int32, (m, wc_in), 0) % h
    up = jnp.where(row == 0, 0.0, up)
    dn = jnp.where(row == h - 1, 0.0, dn)
    slab = jnp.concatenate([up, x2, dn], axis=-1)  # (M, 3*W*Cin), K-folded
    y = jnp.dot(slab.astype(w_ref.dtype), w_ref[...],
                preferred_element_type=jnp.float32)
    return y.reshape(bt, h, w_ref.shape[-1])


def _double_conv_kernel(x_ref, w1_ref, g1_ref, be1_ref, w2_ref, g2_ref, be2_ref,
                        o_ref, *, residual):
    x = x_ref[...]                                 # (Bt, H, W*Cin), f32

    # conv1 -> GroupNorm(1) -> GELU
    y = _conv3x3(x, w1_ref)
    y = _gelu(_group_norm1(y, g1_ref[...], be1_ref[...]))

    # conv2 -> GroupNorm(1)
    z = _conv3x3(y, w2_ref)
    z = _group_norm1(z, g2_ref[...], be2_ref[...])

    if residual:  # layouts match: both are (Bt, H, W*C) with channel minor
        z = _gelu(x + z)

    o_ref[...] = z                                 # lane-dense (last dim W*Cout)


def _banded_conv_weights(w_oihw, W, dtype):
    """PyTorch OIHW 3x3 weight -> (3*W*Cin, W*Cout) K-folded banded matmul weight.

    B[ky*W*Cin + v*Cin + ci, w*Cout + co] = w[co, ci, ky, v-w+1] if |v-w| <= 1 else 0,
    so the 3x3 "same" conv (zero padding) becomes ONE (M, 3*W*Cin) x (3*W*Cin, W*Cout)
    matmul per conv; horizontal zero padding is implicit in the band.
    """
    co, ci, kh, kw = w_oihw.shape
    assert (kh, kw) == (3, 3), "DoubleConv uses 3x3 convolutions"
    wt = jnp.transpose(w_oihw, (2, 3, 1, 0)).astype(jnp.float32)  # (ky,kx,ci,co)
    sel = np.zeros((3, W, W), np.float32)
    for kx in range(3):
        for w in range(W):
            v = w + kx - 1
            if 0 <= v < W:
                sel[kx, w, v] = 1.0
    bm = jnp.einsum('xwv,gxio->gviwo', jnp.asarray(sel), wt)      # (ky,v,ci,w,co)
    return bm.reshape(3 * W * ci, W * co).astype(dtype)


def _tile_channel_param(p, W):
    # per-channel (C,) -> (1, W*C) matching lane index j = w*C + c
    return jnp.tile(p.astype(jnp.float32).reshape(-1), W).reshape(1, -1)


def _mxu_m_target():
    try:
        kind = jax.devices()[0].device_kind.lower()
    except Exception:
        return 256
    if "v5e" in kind or "v5 lite" in kind or "v5litepod" in kind:
        return 128         # v5e MXU is 128-deep
    return 256             # v6e / v7x MXU is 256-deep


def _pick_batch_tile(B, H, target_m, min_grid=2):
    # Keep Bt == 1 when H is not sublane-aligned so the (Bt,H,W*C)->(Bt*H,W*C)
    # collapse inside the kernel stays relayout-free.
    if H % 8 != 0:
        return 1
    divs = [d for d in range(1, B + 1) if B % d == 0]
    # >= min_grid steps: gives the BlockSpec pipeline something to prefetch against
    # and lets the "parallel" batch axis shard across v7x's two TensorCores.
    pipelined = [d for d in divs if B // d >= min_grid] or divs
    fit = [d for d in pipelined if d * H <= target_m]
    return max(fit) if fit else min(pipelined)


def _vmem_limit_bytes(Bt, H, wc_in, wc_mid, wc_out, mm_itemsize):
    f32 = 4
    act = 2 * Bt * H * (wc_in + wc_out) * f32             # double-buffered in/out tiles
    weights = (3 * wc_in * wc_mid + 3 * wc_mid * wc_out) * mm_itemsize  # single-buffered
    gn_params = 2 * (wc_mid + wc_out) * f32
    # in-kernel temporaries: K-folded slabs (f32 + matmul dtype), conv/GN intermediates
    scratch = (Bt * H * 3 * (wc_in + wc_mid) * (f32 + mm_itemsize)
               + 4 * Bt * H * max(wc_mid, wc_out) * f32)
    need = act + weights + gn_params + scratch
    return int(min(64 << 20, max(8 << 20, 4 * need)))      # v7x budget: 64 MiB physical


def double_conv_ldense(x_ld, W, params, *, residual=False,
                       matmul_dtype=jnp.bfloat16,
                       single_buffer_invariants=True):
    """DoubleConv on lane-dense activations (recommended end-to-end layout).

    x_ld: (B, H, W*Cin) with lane index j = w*Cin + ci (channels minor).
    params = (w1, g1, b1, w2, g2, b2); conv weights in PyTorch OIHW layout.
    Returns (B, H, W*Cout) in the same lane-dense layout (no HBM transposes).
    """
    w1, g1, b1, w2, g2, b2 = params
    B, H, WCin = x_ld.shape
    Cmid, Cin = w1.shape[0], w1.shape[1]
    Cout = w2.shape[0]
    if WCin != W * Cin:
        raise ValueError(f"x last dim {WCin} != W*Cin = {W}*{Cin}")
    if w2.shape[1] != Cmid:
        raise ValueError("conv2 in_channels must equal conv1 out_channels")
    if residual and Cin != Cout:
        raise ValueError(
            f"residual=True requires in_channels == out_channels ({Cin} vs {Cout})")

    x32 = x_ld.astype(jnp.float32)
    w1k = _banded_conv_weights(w1, W, matmul_dtype)       # (3*W*Cin,  W*Cmid)
    w2k = _banded_conv_weights(w2, W, matmul_dtype)       # (3*W*Cmid, W*Cout)
    g1t, be1t = _tile_channel_param(g1, W), _tile_channel_param(b1, W)
    g2t, be2t = _tile_channel_param(g2, W), _tile_channel_param(b2, W)

    Bt = _pick_batch_tile(B, H, _mxu_m_target())
    kernel = functools.partial(_double_conv_kernel, residual=residual)
    vmem_limit = _vmem_limit_bytes(Bt, H, W * Cin, W * Cmid, W * Cout,
                                   np.dtype(matmul_dtype).itemsize)

    def run(single_buffer):
        def inv_spec(shape):
            # Grid-invariant operand: constant index_map -> a 2nd pipeline buffer is
            # pure VMEM waste (matters most under v7x's 64 MiB at realistic W).
            if single_buffer:
                return pl.BlockSpec(shape, lambda i: (0,) * len(shape),
                                    pipeline_mode=pl.Buffered(1))
            return pl.BlockSpec(shape, lambda i: (0,) * len(shape))

        return pl.pallas_call(
            kernel,
            out_shape=jax.ShapeDtypeStruct((B, H, W * Cout), jnp.float32),
            grid_spec=pltpu.PrefetchScalarGridSpec(
                num_scalar_prefetch=0,
                grid=(B // Bt,),
                in_specs=[
                    pl.BlockSpec((Bt, H, W * Cin), lambda i: (i, 0, 0)),
                    inv_spec((3 * W * Cin, W * Cmid)),
                    inv_spec((1, W * Cmid)),
                    inv_spec((1, W * Cmid)),
                    inv_spec((3 * W * Cmid, W * Cout)),
                    inv_spec((1, W * Cout)),
                    inv_spec((1, W * Cout)),
                ],
                out_specs=pl.BlockSpec((Bt, H, W * Cout), lambda i: (i, 0, 0)),
            ),
            compiler_params=pltpu.CompilerParams(
                dimension_semantics=("parallel",),    # batch tiles are independent
                vmem_limit_bytes=vmem_limit),
        )(x32, w1k, g1t, be1t, w2k, g2t, be2t)

    if single_buffer_invariants:
        try:
            return run(True)
        except Exception:
            pass  # pl.Buffered(1) unsupported on this jax/Mosaic -> default buffering
    return run(False)


def double_conv(x_nchw, params, residual=False, matmul_dtype=jnp.bfloat16):
    """PyTorch-layout (NCHW) adapter around double_conv_ldense.

    NOTE(perf): the two transposes here are full extra HBM round-trips of the
    activation (review item #1).  They exist only to match the PyTorch interface for
    testing; keep the model lane-dense and call double_conv_ldense to drop them.
    """
    w1, g1, b1, w2, g2, b2 = params
    B, Cin, H, W = x_nchw.shape
    Cout = w2.shape[0]
    x_ld = jnp.transpose(x_nchw, (0, 2, 3, 1)).reshape(B, H, W * Cin)
    out_ld = double_conv_ldense(x_ld, W, params, residual=residual,
                                matmul_dtype=matmul_dtype)
    return jnp.transpose(out_ld.reshape(B, H, W, Cout), (0, 3, 1, 2))


# ---------------- pure-JAX reference (sanity check in __main__) ----------------
def _ref_double_conv(x_nchw, params, residual=False):
    w1, g1, b1, w2, g2, b2 = params

    def conv(x, w):
        return jax.lax.conv_general_dilated(
            x, w, (1, 1), ((1, 1), (1, 1)),
            dimension_numbers=("NCHW", "OIHW", "NCHW"))

    def gn(x, g, b, eps=1e-5):
        mean = jnp.mean(x, axis=(1, 2, 3), keepdims=True)
        var = jnp.mean((x - mean) ** 2, axis=(1, 2, 3), keepdims=True)
        xh = (x - mean) / jnp.sqrt(var + eps)
        return xh * g.reshape(1, -1, 1, 1) + b.reshape(1, -1, 1, 1)

    def gelu(x):
        return 0.5 * x * (1.0 + jax.scipy.special.erf(x * _SQRT_HALF))

    y = gelu(gn(conv(x_nchw, w1), g1, b1))
    y = gn(conv(y, w2), g2, b2)
    if residual:
        y = gelu(x_nchw + y)
    return y


if __name__ == "__main__":
    key = jax.random.PRNGKey(0)
    B, Cin, H, W = 2, 4, 16, 16
    Cmid = Cout = 8
    ks = jax.random.split(key, 6)

    x = jax.random.normal(ks[0], (B, Cin, H, W), jnp.float32)

    # PyTorch shapes: Conv2d weight = (O, I, 3, 3), bias=False; GroupNorm affine = (C,).
    w1 = jax.random.normal(ks[1], (Cmid, Cin, 3, 3), jnp.float32) / jnp.sqrt(9.0 * Cin)
    w2 = jax.random.normal(ks[2], (Cout, Cmid, 3, 3), jnp.float32) / jnp.sqrt(9.0 * Cmid)
    g1 = jnp.ones((Cmid,), jnp.float32)
    b1 = jnp.zeros((Cmid,), jnp.float32)
    g2 = jnp.ones((Cout,), jnp.float32)
    b2 = jnp.zeros((Cout,), jnp.float32)
    params = (w1, g1, b1, w2, g2, b2)

    # ---- DoubleConv(4, 8), residual=False ----
    y_ref = _ref_double_conv(x, params, residual=False)

    # f32 matmul operands: tight check of the algorithm.
    y32 = jax.block_until_ready(
        double_conv(x, params, residual=False, matmul_dtype=jnp.float32))
    assert y32.shape == (B, Cout, H, W)
    assert jnp.allclose(y32, y_ref, atol=1e-4, rtol=1e-4)

    # Default bf16 matmul operands (f32 accumulation): looser check (~1e-2 worst case
    # at K=192/384; GN/GELU stay f32).
    ybf = jax.block_until_ready(double_conv(x, params, residual=False))
    assert ybf.shape == (B, Cout, H, W)
    assert jnp.allclose(ybf, y_ref, atol=5e-2, rtol=5e-2)

    # ---- DoubleConv(8, 8, residual=True) ----
    w1r = jax.random.normal(ks[3], (Cout, Cout, 3, 3), jnp.float32) / jnp.sqrt(9.0 * Cout)
    w2r = jax.random.normal(ks[4], (Cout, Cout, 3, 3), jnp.float32) / jnp.sqrt(9.0 * Cout)
    params_r = (w1r, g2, b2, w2r, g2, b2)
    yr_ref = _ref_double_conv(y32, params_r, residual=True)

    yr32 = jax.block_until_ready(
        double_conv(y32, params_r, residual=True, matmul_dtype=jnp.float32))
    assert yr32.shape == (B, Cout, H, W)
    assert jnp.allclose(yr32, yr_ref, atol=1e-4, rtol=1e-4)

    yrbf = jax.block_until_ready(double_conv(y32, params_r, residual=True))
    assert jnp.allclose(yrbf, yr_ref, atol=5e-2, rtol=5e-2)

    print("KERNEL_OK")
</pallas_src>

<mosaic_0001>
module attributes {stable_mosaic.version = 11 : i64} {
  func.func @_double_conv_kernel(%arg0: i32, %arg1: memref<1x16x64xf32, #tpu.memory_space<vmem>>, %arg2: memref<192x128xf32, #tpu.memory_space<vmem>>, %arg3: memref<1x128xf32, #tpu.memory_space<vmem>>, %arg4: memref<1x128xf32, #tpu.memory_space<vmem>>, %arg5: memref<384x128xf32, #tpu.memory_space<vmem>>, %arg6: memref<1x128xf32, #tpu.memory_space<vmem>>, %arg7: memref<1x128xf32, #tpu.memory_space<vmem>>, %arg8: memref<1x16x128xf32, #tpu.memory_space<vmem>>) attributes {dimension_semantics = [#tpu.dimension_semantics<parallel>], iteration_bounds = array<i64: 2>, scalar_prefetch = 0 : i64, scratch_operands = 0 : i64, tpu.core_type = #tpu.core_type<tc>, window_params = [{transform_indices = @transform_0, window_bounds = array<i64: 1, 16, 64>}, {pipeline_mode = #tpu.pipeline_mode<synchronous>, transform_indices = @transform_1, window_bounds = array<i64: 192, 128>}, {pipeline_mode = #tpu.pipeline_mode<synchronous>, transform_indices = @transform_2, window_bounds = array<i64: 1, 128>}, {pipeline_mode = #tpu.pipeline_mode<synchronous>, transform_indices = @transform_3, window_bounds = array<i64: 1, 128>}, {pipeline_mode = #tpu.pipeline_mode<synchronous>, transform_indices = @transform_4, window_bounds = array<i64: 384, 128>}, {pipeline_mode = #tpu.pipeline_mode<synchronous>, transform_indices = @transform_5, window_bounds = array<i64: 1, 128>}, {pipeline_mode = #tpu.pipeline_mode<synchronous>, transform_indices = @transform_6, window_bounds = array<i64: 1, 128>}, {transform_indices = @transform_7, window_bounds = array<i64: 1, 16, 128>}]} {
    %c0 = arith.constant 0 : index
    %c0_0 = arith.constant 0 : index
    %c0_1 = arith.constant 0 : index
    %0 = vector.load %arg1[%c0, %c0_0, %c0_1] : memref<1x16x64xf32, #tpu.memory_space<vmem>>, vector<1x16x64xf32>
    %1 = vector.shape_cast %0 : vector<1x16x64xf32> to vector<16x64xf32>
    %c1_i32 = arith.constant 1 : i32
    %2 = tpu.dynamic_rotate %1 by %c1_i32 dim 0 : vector<16x64xf32>, i32 -> vector<16x64xf32>
    %c15_i32 = arith.constant 15 : i32
    %3 = tpu.dynamic_rotate %1 by %c15_i32 dim 0 : vector<16x64xf32>, i32 -> vector<16x64xf32>
    %4 = tpu.iota {dimensions = array<i32: 0>} : vector<16x64xi32>
    %c16_i32 = arith.constant 16 : i32
    %c0_i32 = arith.constant 0 : i32
    %5 = arith.cmpi eq, %c16_i32, %c0_i32 : i32
    %c1_i32_2 = arith.constant 1 : i32
    %6 = arith.select %5, %c1_i32_2, %c16_i32 : i32
    %7 = vector.broadcast %6 : i32 to vector<16x64xi32>
    %8 = arith.remsi %4, %7 : vector<16x64xi32>
    %c0_i32_3 = arith.constant 0 : i32
    %9 = vector.broadcast %c0_i32_3 : i32 to vector<16x64xi32>
    %10 = arith.cmpi ne, %8, %9 : vector<16x64xi32>
    %c0_i32_4 = arith.constant 0 : i32
    %11 = vector.broadcast %c0_i32_4 : i32 to vector<16x64xi32>
    %12 = arith.cmpi slt, %8, %11 : vector<16x64xi32>
    %c0_i32_5 = arith.constant 0 : i32
    %13 = arith.cmpi slt, %6, %c0_i32_5 : i32
    %14 = vector.broadcast %13 : i1 to vector<16x64xi1>
    %15 = vector.broadcast %14 : vector<16x64xi1> to vector<16x64xi1>
    %16 = arith.xori %12, %15 : vector<16x64xi1>
    %17 = arith.andi %16, %10 : vector<16x64xi1>
    %18 = vector.broadcast %6 : i32 to vector<16x64xi32>
    %19 = arith.addi %8, %18 : vector<16x64xi32>
    %20 = arith.select %17, %19, %8 : vector<16x64xi1>, vector<16x64xi32>
    %c0_i32_6 = arith.constant 0 : i32
    %21 = vector.broadcast %c0_i32_6 : i32 to vector<16x64xi32>
    %22 = arith.cmpi eq, %20, %21 : vector<16x64xi32>
    %cst = arith.constant 0.000000e+00 : f32
    %23 = vector.broadcast %cst : f32 to vector<16x64xf32>
    %24 = arith.select %22, %23, %2 : vector<16x64xi1>, vector<16x64xf32>
    %c15_i32_7 = arith.constant 15 : i32
    %25 = vector.broadcast %c15_i32_7 : i32 to vector<16x64xi32>
    %26 = arith.cmpi eq, %20, %25 : vector<16x64xi32>
    %cst_8 = arith.constant 0.000000e+00 : f32
    %27 = vector.broadcast %cst_8 : f32 to vector<16x64xf32>
    %28 = arith.select %26, %27, %3 : vector<16x64xi1>, vector<16x64xf32>
    %29 = tpu.concatenate %24, %1, %28 in 1 : vector<16x64xf32>, vector<16x64xf32>, vector<16x64xf32> -> vector<16x192xf32>
    %c0_9 = arith.constant 0 : index
    %c0_10 = arith.constant 0 : index
    %30 = vector.load %arg2[%c0_9, %c0_10] : memref<192x128xf32, #tpu.memory_space<vmem>>, vector<192x128xf32>
    %cst_11 = arith.constant dense<0.000000e+00> : vector<16x128xf32>
    %31 = tpu.matmul %29, %30, %cst_11 {dimension_numbers = #tpu.dot_dimension_numbers<[1], [0], [0], [1], [0, 0, 1, 1], [], []>} : vector<16x192xf32>, vector<192x128xf32>, vector<16x128xf32> -> vector<16x128xf32>
    %32 = vector.shape_cast %31 : vector<16x128xf32> to vector<1x16x128xf32>
    %c0_12 = arith.constant 0 : index
    %c0_13 = arith.constant 0 : index
    %33 = vector.load %arg3[%c0_12, %c0_13] : memref<1x128xf32, #tpu.memory_space<vmem>>, vector<1x128xf32>
    %c0_14 = arith.constant 0 : index
    %c0_15 = arith.constant 0 : index
    %34 = vector.load %arg4[%c0_14, %c0_15] : memref<1x128xf32, #tpu.memory_space<vmem>>, vector<1x128xf32>
    %cst_16 = arith.constant dense<0.000000e+00> : vector<1xf32>
    %35 = vector.multi_reduction <add>, %32, %cst_16 [1, 2] : vector<1x16x128xf32> to vector<1xf32>
    %36 = vector.shape_cast %35 : vector<1xf32> to vector<1x1x1xf32>
    %37 = arith.mulf %32, %32 : vector<1x16x128xf32>
    %cst_17 = arith.constant dense<0.000000e+00> : vector<1xf32>
    %38 = vector.multi_reduction <add>, %37, %cst_17 [1, 2] : vector<1x16x128xf32> to vector<1xf32>
    %39 = vector.shape_cast %38 : vector<1xf32> to vector<1x1x1xf32>
    %cst_18 = arith.constant 4.8828125E-4 : f32
    %40 = vector.broadcast %cst_18 : f32 to vector<1x1x1xf32>
    %41 = arith.mulf %36, %40 : vector<1x1x1xf32>
    %cst_19 = arith.constant 4.8828125E-4 : f32
    %42 = vector.broadcast %cst_19 : f32 to vector<1x1x1xf32>
    %43 = arith.mulf %39, %42 : vector<1x1x1xf32>
    %44 = arith.mulf %41, %41 : vector<1x1x1xf32>
    %45 = arith.subf %43, %44 : vector<1x1x1xf32>
    %cst_20 = arith.constant 0.000000e+00 : f32
    %46 = vector.broadcast %cst_20 : f32 to vector<1x1x1xf32>
    %47 = arith.maximumf %45, %46 : vector<1x1x1xf32>
    %48 = vector.broadcast %41 : vector<1x1x1xf32> to vector<1x16x128xf32>
    %49 = arith.subf %32, %48 : vector<1x16x128xf32>
    %cst_21 = arith.constant 9.99999974E-6 : f32
    %50 = vector.broadcast %cst_21 : f32 to vector<1x1x1xf32>
    %51 = arith.addf %47, %50 : vector<1x1x1xf32>
    %52 = math.rsqrt %51 : vector<1x1x1xf32>
    %53 = vector.broadcast %52 : vector<1x1x1xf32> to vector<1x16x128xf32>
    %54 = arith.mulf %49, %53 : vector<1x16x128xf32>
    %55 = vector.shape_cast %33 : vector<1x128xf32> to vector<1x1x128xf32>
    %56 = vector.broadcast %55 : vector<1x1x128xf32> to vector<1x16x128xf32>
    %57 = arith.mulf %54, %56 : vector<1x16x128xf32>
    %58 = vector.shape_cast %34 : vector<1x128xf32> to vector<1x1x128xf32>
    %59 = vector.broadcast %58 : vector<1x1x128xf32> to vector<1x16x128xf32>
    %60 = arith.addf %57, %59 : vector<1x16x128xf32>
    %cst_22 = arith.constant 5.000000e-01 : f32
    %61 = vector.broadcast %cst_22 : f32 to vector<1x16x128xf32>
    %62 = arith.mulf %61, %60 : vector<1x16x128xf32>
    %cst_23 = arith.constant 0.707106769 : f32
    %63 = vector.broadcast %cst_23 : f32 to vector<1x16x128xf32>
    %64 = arith.mulf %60, %63 : vector<1x16x128xf32>
    %cst_24 = arith.constant 0.000000e+00 : f32
    %65 = vector.broadcast %cst_24 : f32 to vector<1x16x128xf32>
    %66 = arith.cmpf oge, %64, %65 : vector<1x16x128xf32>
    %cst_25 = arith.constant 1.000000e+00 : f32
    %cst_26 = arith.constant -1.000000e+00 : f32
    %67 = vector.broadcast %cst_25 : f32 to vector<1x16x128xf32>
    %68 = vector.broadcast %cst_26 : f32 to vector<1x16x128xf32>
    %69 = arith.select %66, %67, %68 : vector<1x16x128xi1>, vector<1x16x128xf32>
    %70 = math.absf %64 : vector<1x16x128xf32>
    %cst_27 = arith.constant 0.327591091 : f32
    %71 = vector.broadcast %cst_27 : f32 to vector<1x16x128xf32>
    %72 = arith.mulf %71, %70 : vector<1x16x128xf32>
    %cst_28 = arith.constant 1.000000e+00 : f32
    %73 = vector.broadcast %cst_28 : f32 to vector<1x16x128xf32>
    %74 = arith.addf %73, %72 : vector<1x16x128xf32>
    %75 = tpu.reciprocal %74 {approx = true} : vector<1x16x128xf32> -> vector<1x16x128xf32>
    %76 = arith.mulf %74, %75 : vector<1x16x128xf32>
    %cst_29 = arith.constant 2.000000e+00 : f32
    %77 = vector.broadcast %cst_29 : f32 to vector<1x16x128xf32>
    %78 = arith.subf %77, %76 : vector<1x16x128xf32>
    %79 = arith.mulf %75, %78 : vector<1x16x128xf32>
    %cst_30 = arith.constant 1.06140542 : f32
    %80 = vector.broadcast %cst_30 : f32 to vector<1x16x128xf32>
    %81 = arith.mulf %79, %80 : vector<1x16x128xf32>
    %cst_31 = arith.constant -1.45315206 : f32
    %82 = vector.broadcast %cst_31 : f32 to vector<1x16x128xf32>
    %83 = arith.addf %82, %81 : vector<1x16x128xf32>
    %84 = arith.mulf %79, %83 : vector<1x16x128xf32>
    %cst_32 = arith.constant 1.42141378 : f32
    %85 = vector.broadcast %cst_32 : f32 to vector<1x16x128xf32>
    %86 = arith.addf %85, %84 : vector<1x16x128xf32>
    %87 = arith.mulf %79, %86 : vector<1x16x128xf32>
    %cst_33 = arith.constant -0.284496725 : f32
    %88 = vector.broadcast %cst_33 : f32 to vector<1x16x128xf32>
    %89 = arith.addf %88, %87 : vector<1x16x128xf32>
    %90 = arith.mulf %79, %89 : vector<1x16x128xf32>
    %cst_34 = arith.constant 0.254829586 : f32
    %91 = vector.broadcast %cst_34 : f32 to vector<1x16x128xf32>
    %92 = arith.addf %91, %90 : vector<1x16x128xf32>
    %93 = arith.mulf %79, %92 : vector<1x16x128xf32>
    %cst_35 = arith.constant 0.000000e+00 : f32
    %94 = vector.broadcast %cst_35 : f32 to vector<1x16x128xf32>
    %95 = arith.subf %94, %70 : vector<1x16x128xf32>
    %96 = arith.mulf %95, %70 : vector<1x16x128xf32>
    %97 = math.exp %96 : vector<1x16x128xf32>
    %98 = arith.mulf %93, %97 : vector<1x16x128xf32>
    %cst_36 = arith.constant 1.000000e+00 : f32
    %99 = vector.broadcast %cst_36 : f32 to vector<1x16x128xf32>
    %100 = arith.subf %99, %98 : vector<1x16x128xf32>
    %101 = arith.mulf %69, %100 : vector<1x16x128xf32>
    %cst_37 = arith.constant 1.000000e+00 : f32
    %102 = vector.broadcast %cst_37 : f32 to vector<1x16x128xf32>
    %103 = arith.addf %102, %101 : vector<1x16x128xf32>
    %104 = arith.mulf %62, %103 : vector<1x16x128xf32>
    %105 = vector.shape_cast %104 : vector<1x16x128xf32> to vector<16x128xf32>
    %c1_i32_38 = arith.constant 1 : i32
    %106 = tpu.dynamic_rotate %105 by %c1_i32_38 dim 0 : vector<16x128xf32>, i32 -> vector<16x128xf32>
    %c15_i32_39 = arith.constant 15 : i32
    %107 = tpu.dynamic_rotate %105 by %c15_i32_39 dim 0 : vector<16x128xf32>, i32 -> vector<16x128xf32>
    %108 = tpu.iota {dimensions = array<i32: 0>} : vector<16x128xi32>
    %c16_i32_40 = arith.constant 16 : i32
    %c0_i32_41 = arith.constant 0 : i32
    %109 = arith.cmpi eq, %c16_i32_40, %c0_i32_41 : i32
    %c1_i32_42 = arith.constant 1 : i32
    %110 = arith.select %109, %c1_i32_42, %c16_i32_40 : i32
    %111 = vector.broadcast %110 : i32 to vector<16x128xi32>
    %112 = arith.remsi %108, %111 : vector<16x128xi32>
    %c0_i32_43 = arith.constant 0 : i32
    %113 = vector.broadcast %c0_i32_43 : i32 to vector<16x128xi32>
    %114 = arith.cmpi ne, %112, %113 : vector<16x128xi32>
    %c0_i32_44 = arith.constant 0 : i32
    %115 = vector.broadcast %c0_i32_44 : i32 to vector<16x128xi32>
    %116 = arith.cmpi slt, %112, %115 : vector<16x128xi32>
    %c0_i32_45 = arith.constant 0 : i32
    %117 = arith.cmpi slt, %110, %c0_i32_45 : i32
    %118 = vector.broadcast %117 : i1 to vector<16x128xi1>
    %119 = vector.broadcast %118 : vector<16x128xi1> to vector<16x128xi1>
    %120 = arith.xori %116, %119 : vector<16x128xi1>
    %121 = arith.andi %120, %114 : vector<16x128xi1>
    %122 = vector.broadcast %110 : i32 to vector<16x128xi32>
    %123 = arith.addi %112, %122 : vector<16x128xi32>
    %124 = arith.select %121, %123, %112 : vector<16x128xi1>, vector<16x128xi32>
    %c0_i32_46 = arith.constant 0 : i32
    %125 = vector.broadcast %c0_i32_46 : i32 to vector<16x128xi32>
    %126 = arith.cmpi eq, %124, %125 : vector<16x128xi32>
    %cst_47 = arith.constant 0.000000e+00 : f32
    %127 = vector.broadcast %cst_47 : f32 to vector<16x128xf32>
    %128 = arith.select %126, %127, %106 : vector<16x128xi1>, vector<16x128xf32>
    %c15_i32_48 = arith.constant 15 : i32
    %129 = vector.broadcast %c15_i32_48 : i32 to vector<16x128xi32>
    %130 = arith.cmpi eq, %124, %129 : vector<16x128xi32>
    %cst_49 = arith.constant 0.000000e+00 : f32
    %131 = vector.broadcast %cst_49 : f32 to vector<16x128xf32>
    %132 = arith.select %130, %131, %107 : vector<16x128xi1>, vector<16x128xf32>
    %133 = tpu.concatenate %128, %105, %132 in 1 : vector<16x128xf32>, vector<16x128xf32>, vector<16x128xf32> -> vector<16x384xf32>
    %c0_50 = arith.constant 0 : index
    %c0_51 = arith.constant 0 : index
    %134 = vector.load %arg5[%c0_50, %c0_51] : memref<384x128xf32, #tpu.memory_space<vmem>>, vector<384x128xf32>
    %cst_52 = arith.constant dense<0.000000e+00> : vector<16x128xf32>
    %135 = tpu.matmul %133, %134, %cst_52 {dimension_numbers = #tpu.dot_dimension_numbers<[1], [0], [0], [1], [0, 0, 1, 1], [], []>} : vector<16x384xf32>, vector<384x128xf32>, vector<16x128xf32> -> vector<16x128xf32>
    %136 = vector.shape_cast %135 : vector<16x128xf32> to vector<1x16x128xf32>
    %c0_53 = arith.constant 0 : index
    %c0_54 = arith.constant 0 : index
    %137 = vector.load %arg6[%c0_53, %c0_54] : memref<1x128xf32, #tpu.memory_space<vmem>>, vector<1x128xf32>
    %c0_55 = arith.constant 0 : index
    %c0_56 = arith.constant 0 : index
    %138 = vector.load %arg7[%c0_55, %c0_56] : memref<1x128xf32, #tpu.memory_space<vmem>>, vector<1x128xf32>
    %cst_57 = arith.constant dense<0.000000e+00> : vector<1xf32>
    %139 = vector.multi_reduction <add>, %136, %cst_57 [1, 2] : vector<1x16x128xf32> to vector<1xf32>
    %140 = vector.shape_cast %139 : vector<1xf32> to vector<1x1x1xf32>
    %141 = arith.mulf %136, %136 : vector<1x16x128xf32>
    %cst_58 = arith.constant dense<0.000000e+00> : vector<1xf32>
    %142 = vector.multi_reduction <add>, %141, %cst_58 [1, 2] : vector<1x16x128xf32> to vector<1xf32>
    %143 = vector.shape_cast %142 : vector<1xf32> to vector<1x1x1xf32>
    %cst_59 = arith.constant 4.8828125E-4 : f32
    %144 = vector.broadcast %cst_59 : f32 to vector<1x1x1xf32>
    %145 = arith.mulf %140, %144 : vector<1x1x1xf32>
    %cst_60 = arith.constant 4.8828125E-4 : f32
    %146 = vector.broadcast %cst_60 : f32 to vector<1x1x1xf32>
    %147 = arith.mulf %143, %146 : vector<1x1x1xf32>
    %148 = arith.mulf %145, %145 : vector<1x1x1xf32>
    %149 = arith.subf %147, %148 : vector<1x1x1xf32>
    %cst_61 = arith.constant 0.000000e+00 : f32
    %150 = vector.broadcast %cst_61 : f32 to vector<1x1x1xf32>
    %151 = arith.maximumf %149, %150 : vector<1x1x1xf32>
    %152 = vector.broadcast %145 : vector<1x1x1xf32> to vector<1x16x128xf32>
    %153 = arith.subf %136, %152 : vector<1x16x128xf32>
    %cst_62 = arith.constant 9.99999974E-6 : f32
    %154 = vector.broadcast %cst_62 : f32 to vector<1x1x1xf32>
    %155 = arith.addf %151, %154 : vector<1x1x1xf32>
    %156 = math.rsqrt %155 : vector<1x1x1xf32>
    %157 = vector.broadcast %156 : vector<1x1x1xf32> to vector<1x16x128xf32>
    %158 = arith.mulf %153, %157 : vector<1x16x128xf32>
    %159 = vector.shape_cast %137 : vector<1x128xf32> to vector<1x1x128xf32>
    %160 = vector.broadcast %159 : vector<1x1x128xf32> to vector<1x16x128xf32>
    %161 = arith.mulf %158, %160 : vector<1x16x128xf32>
    %162 = vector.shape_cast %138 : vector<1x128xf32> to vector<1x1x128xf32>
    %163 = vector.broadcast %162 : vector<1x1x128xf32> to vector<1x16x128xf32>
    %164 = arith.addf %161, %163 : vector<1x16x128xf32>
    %c0_63 = arith.constant 0 : index
    %c0_64 = arith.constant 0 : index
    %c0_65 = arith.constant 0 : index
    %165 = vector.load %arg8[%c0_63, %c0_64, %c0_65] : memref<1x16x128xf32, #tpu.memory_space<vmem>>, vector<1x16x128xf32>
    tpu.vector_store %arg8[%c0_63, %c0_64, %c0_65], %164 {strides = array<i32>} : memref<1x16x128xf32, #tpu.memory_space<vmem>>, vector<1x16x128xf32>,
    return
  }
  func.func @transform_0(%arg0: i32) -> (i32, i32, i32) {
    %c0_i32 = arith.constant 0 : i32
    %c0_i32_0 = arith.constant 0 : i32
    %c0_i32_1 = arith.constant 0 : i32
    return %arg0, %c0_i32, %c0_i32_0 : i32, i32, i32
  }
  func.func @transform_1(%arg0: i32) -> (i32, i32) {
    %c0_i32 = arith.constant 0 : i32
    %c0_i32_0 = arith.constant 0 : i32
    %c0_i32_1 = arith.constant 0 : i32
    return %c0_i32, %c0_i32_0 : i32, i32
  }
  func.func @transform_2(%arg0: i32) -> (i32, i32) {
    %c0_i32 = arith.constant 0 : i32
    %c0_i32_0 = arith.constant 0 : i32
    %c0_i32_1 = arith.constant 0 : i32
    return %c0_i32, %c0_i32_0 : i32, i32
  }
  func.func @transform_3(%arg0: i32) -> (i32, i32) {
    %c0_i32 = arith.constant 0 : i32
    %c0_i32_0 = arith.constant 0 : i32
    %c0_i32_1 = arith.constant 0 : i32
    return %c0_i32, %c0_i32_0 : i32, i32
  }
  func.func @transform_4(%arg0: i32) -> (i32, i32) {
    %c0_i32 = arith.constant 0 : i32
    %c0_i32_0 = arith.constant 0 : i32
    %c0_i32_1 = arith.constant 0 : i32
    return %c0_i32, %c0_i32_0 : i32, i32
  }
  func.func @transform_5(%arg0: i32) -> (i32, i32) {
    %c0_i32 = arith.constant 0 : i32
    %c0_i32_0 = arith.constant 0 : i32
    %c0_i32_1 = arith.constant 0 : i32
    return %c0_i32, %c0_i32_0 : i32, i32
  }
  func.func @transform_6(%arg0: i32) -> (i32, i32) {
    %c0_i32 = arith.constant 0 : i32
    %c0_i32_0 = arith.constant 0 : i32
    %c0_i32_1 = arith.constant 0 : i32
    return %c0_i32, %c0_i32_0 : i32, i32
  }
  func.func @transform_7(%arg0: i32) -> (i32, i32, i32) {
    %c0_i32 = arith.constant 0 : i32
    %c0_i32_0 = arith.constant 0 : i32
    %c0_i32_1 = arith.constant 0 : i32
    return %arg0, %c0_i32, %c0_i32_0 : i32, i32, i32
  }
}

module attributes {stable_mosaic.version = 11 : i64} {
  func.func @_double_conv_kernel(%arg0: i32, %arg1: memref<1x16x64xf32, #tpu.memory_space<vmem>>, %arg2: memref<192x128xf32, #tpu.memory_space<vmem>>, %arg3: memref<1x128xf32, #tpu.memory_space<vmem>>, %arg4: memref<1x128xf32, #tpu.memory_space<vmem>>, %arg5: memref<384x128xf32, #tpu.memory_space<vmem>>, %arg6: memref<1x128xf32, #tpu.memory_space<vmem>>, %arg7: memref<1x128xf32, #tpu.memory_space<vmem>>, %arg8: memref<1x16x128xf32, #tpu.memory_space<vmem>>) attributes {dimension_semantics = [#tpu.dimension_semantics<parallel>], iteration_bounds = array<i64: 2>, scalar_prefetch = 0 : i64, scratch_operands = 0 : i64, tpu.core_type = #tpu.core_type<tc>, window_params = [{transform_indices = @transform_0, window_bounds = array<i64: 1, 16, 64>}, {pipeline_mode = #tpu.pipeline_mode<synchronous>, transform_indices = @transform_1, window_bounds = array<i64: 192, 128>}, {pipeline_mode = #tpu.pipeline_mode<synchronous>, transform_indices = @transform_2, window_bounds = array<i64: 1, 128>}, {pipeline_mode = #tpu.pipeline_mode<synchronous>, transform_indices = @transform_3, window_bounds = array<i64: 1, 128>}, {pipeline_mode = #tpu.pipeline_mode<synchronous>, transform_indices = @transform_4, window_bounds = array<i64: 384, 128>}, {pipeline_mode = #tpu.pipeline_mode<synchronous>, transform_indices = @transform_5, window_bounds = array<i64: 1, 128>}, {pipeline_mode = #tpu.pipeline_mode<synchronous>, transform_indices = @transform_6, window_bounds = array<i64: 1, 128>}, {transform_indices = @transform_7, window_bounds = array<i64: 1, 16, 128>}]} {
    %c0 = arith.constant 0 : index
    %c0_0 = arith.constant 0 : index
    %c0_1 = arith.constant 0 : index
    %0 = vector.load %arg1[%c0, %c0_0, %c0_1] : memref<1x16x64xf32, #tpu.memory_space<vmem>>, vector<1x16x64xf32>
    %1 = vector.shape_cast %0 : vector<1x16x64xf32> to vector<16x64xf32>
    %c1_i32 = arith.constant 1 : i32
    %2 = tpu.dynamic_rotate %1 by %c1_i32 dim 0 : vector<16x64xf32>, i32 -> vector<16x64xf32>
    %c15_i32 = arith.constant 15 : i32
    %3 = tpu.dynamic_rotate %1 by %c15_i32 dim 0 : vector<16x64xf32>, i32 -> vector<16x64xf32>
    %4 = tpu.iota {dimensions = array<i32: 0>} : vector<16x64xi32>
    %c16_i32 = arith.constant 16 : i32
    %c0_i32 = arith.constant 0 : i32
    %5 = arith.cmpi eq, %c16_i32, %c0_i32 : i32
    %c1_i32_2 = arith.constant 1 : i32
    %6 = arith.select %5, %c1_i32_2, %c16_i32 : i32
    %7 = vector.broadcast %6 : i32 to vector<16x64xi32>
    %8 = arith.remsi %4, %7 : vector<16x64xi32>
    %c0_i32_3 = arith.constant 0 : i32
    %9 = vector.broadcast %c0_i32_3 : i32 to vector<16x64xi32>
    %10 = arith.cmpi ne, %8, %9 : vector<16x64xi32>
    %c0_i32_4 = arith.constant 0 : i32
    %11 = vector.broadcast %c0_i32_4 : i32 to vector<16x64xi32>
    %12 = arith.cmpi slt, %8, %11 : vector<16x64xi32>
    %c0_i32_5 = arith.constant 0 : i32
    %13 = arith.cmpi slt, %6, %c0_i32_5 : i32
    %14 = vector.broadcast %13 : i1 to vector<16x64xi1>
    %15 = vector.broadcast %14 : vector<16x64xi1> to vector<16x64xi1>
    %16 = arith.xori %12, %15 : vector<16x64xi1>
    %17 = arith.andi %16, %10 : vector<16x64xi1>
    %18 = vector.broadcast %6 : i32 to vector<16x64xi32>
    %19 = arith.addi %8, %18 : vector<16x64xi32>
    %20 = arith.select %17, %19, %8 : vector<16x64xi1>, vector<16x64xi32>
    %c0_i32_6 = arith.constant 0 : i32
    %21 = vector.broadcast %c0_i32_6 : i32 to vector<16x64xi32>
    %22 = arith.cmpi eq, %20, %21 : vector<16x64xi32>
    %cst = arith.constant 0.000000e+00 : f32
    %23 = vector.broadcast %cst : f32 to vector<16x64xf32>
    %24 = arith.select %22, %23, %2 : vector<16x64xi1>, vector<16x64xf32>
    %c15_i32_7 = arith.constant 15 : i32
    %25 = vector.broadcast %c15_i32_7 : i32 to vector<16x64xi32>
    %26 = arith.cmpi eq, %20, %25 : vector<16x64xi32>
    %cst_8 = arith.constant 0.000000e+00 : f32
    %27 = vector.broadcast %cst_8 : f32 to vector<16x64xf32>
    %28 = arith.select %26, %27, %3 : vector<16x64xi1>, vector<16x64xf32>
    %29 = tpu.concatenate %24, %1, %28 in 1 : vector<16x64xf32>, vector<16x64xf32>, vector<16x64xf32> -> vector<16x192xf32>
    %c0_9 = arith.constant 0 : index
    %c0_10 = arith.constant 0 : index
    %30 = vector.load %arg2[%c0_9, %c0_10] : memref<192x128xf32, #tpu.memory_space<vmem>>, vector<192x128xf32>
    %cst_11 = arith.constant dense<0.000000e+00> : vector<16x128xf32>
    %31 = tpu.matmul %29, %30, %cst_11 {dimension_numbers = #tpu.dot_dimension_numbers<[1], [0], [0], [1], [0, 0, 1, 1], [], []>} : vector<16x192xf32>, vector<192x128xf32>, vector<16x128xf32> -> vector<16x128xf32>
    %32 = vector.shape_cast %31 : vector<16x128xf32> to vector<1x16x128xf32>
    %c0_12 = arith.constant 0 : index
    %c0_13 = arith.constant 0 : index
    %33 = vector.load %arg3[%c0_12, %c0_13] : memref<1x128xf32, #tpu.memory_space<vmem>>, vector<1x128xf32>
    %c0_14 = arith.constant 0 : index
    %c0_15 = arith.constant 0 : index
    %34 = vector.load %arg4[%c0_14, %c0_15] : memref<1x128xf32, #tpu.memory_space<vmem>>, vector<1x128xf32>
    %cst_16 = arith.constant dense<0.000000e+00> : vector<1xf32>
    %35 = vector.multi_reduction <add>, %32, %cst_16 [1, 2] : vector<1x16x128xf32> to vector<1xf32>
    %36 = vector.shape_cast %35 : vector<1xf32> to vector<1x1x1xf32>
    %37 = arith.mulf %32, %32 : vector<1x16x128xf32>
    %cst_17 = arith.constant dense<0.000000e+00> : vector<1xf32>
    %38 = vector.multi_reduction <add>, %37, %cst_17 [1, 2] : vector<1x16x128xf32> to vector<1xf32>
    %39 = vector.shape_cast %38 : vector<1xf32> to vector<1x1x1xf32>
    %cst_18 = arith.constant 4.8828125E-4 : f32
    %40 = vector.broadcast %cst_18 : f32 to vector<1x1x1xf32>
    %41 = arith.mulf %36, %40 : vector<1x1x1xf32>
    %cst_19 = arith.constant 4.8828125E-4 : f32
    %42 = vector.broadcast %cst_19 : f32 to vector<1x1x1xf32>
    %43 = arith.mulf %39, %42 : vector<1x1x1xf32>
    %44 = arith.mulf %41, %41 : vector<1x1x1xf32>
    %45 = arith.subf %43, %44 : vector<1x1x1xf32>
    %cst_20 = arith.constant 0.000000e+00 : f32
    %46 = vector.broadcast %cst_20 : f32 to vector<1x1x1xf32>
    %47 = arith.maximumf %45, %46 : vector<1x1x1xf32>
    %48 = vector.broadcast %41 : vector<1x1x1xf32> to vector<1x16x128xf32>
    %49 = arith.subf %32, %48 : vector<1x16x128xf32>
    %cst_21 = arith.constant 9.99999974E-6 : f32
    %50 = vector.broadcast %cst_21 : f32 to vector<1x1x1xf32>
    %51 = arith.addf %47, %50 : vector<1x1x1xf32>
    %52 = math.rsqrt %51 : vector<1x1x1xf32>
    %53 = vector.broadcast %52 : vector<1x1x1xf32> to vector<1x16x128xf32>
    %54 = arith.mulf %49, %53 : vector<1x16x128xf32>
    %55 = vector.shape_cast %33 : vector<1x128xf32> to vector<1x1x128xf32>
    %56 = vector.broadcast %55 : vector<1x1x128xf32> to vector<1x16x128xf32>
    %57 = arith.mulf %54, %56 : vector<1x16x128xf32>
    %58 = vector.shape_cast %34 : vector<1x128xf32> to vector<1x1x128xf32>
    %59 = vector.broadcast %58 : vector<1x1x128xf32> to vector<1x16x128xf32>
    %60 = arith.addf %57, %59 : vector<1x16x128xf32>
    %cst_22 = arith.constant 5.000000e-01 : f32
    %61 = vector.broadcast %cst_22 : f32 to vector<1x16x128xf32>
    %62 = arith.mulf %61, %60 : vector<1x16x128xf32>
    %cst_23 = arith.constant 0.707106769 : f32
    %63 = vector.broadcast %cst_23 : f32 to vector<1x16x128xf32>
    %64 = arith.mulf %60, %63 : vector<1x16x128xf32>
    %cst_24 = arith.constant 0.000000e+00 : f32
    %65 = vector.broadcast %cst_24 : f32 to vector<1x16x128xf32>
    %66 = arith.cmpf oge, %64, %65 : vector<1x16x128xf32>
    %cst_25 = arith.constant 1.000000e+00 : f32
    %cst_26 = arith.constant -1.000000e+00 : f32
    %67 = vector.broadcast %cst_25 : f32 to vector<1x16x128xf32>
    %68 = vector.broadcast %cst_26 : f32 to vector<1x16x128xf32>
    %69 = arith.select %66, %67, %68 : vector<1x16x128xi1>, vector<1x16x128xf32>
    %70 = math.absf %64 : vector<1x16x128xf32>
    %cst_27 = arith.constant 0.327591091 : f32
    %71 = vector.broadcast %cst_27 : f32 to vector<1x16x128xf32>
    %72 = arith.mulf %71, %70 : vector<1x16x128xf32>
    %cst_28 = arith.constant 1.000000e+00 : f32
    %73 = vector.broadcast %cst_28 : f32 to vector<1x16x128xf32>
    %74 = arith.addf %73, %72 : vector<1x16x128xf32>
    %75 = tpu.reciprocal %74 {approx = true} : vector<1x16x128xf32> -> vector<1x16x128xf32>
    %76 = arith.mulf %74, %75 : vector<1x16x128xf32>
    %cst_29 = arith.constant 2.000000e+00 : f32
    %77 = vector.broadcast %cst_29 : f32 to vector<1x16x128xf32>
    %78 = arith.subf %77, %76 : vector<1x16x128xf32>
    %79 = arith.mulf %75, %78 : vector<1x16x128xf32>
    %cst_30 = arith.constant 1.06140542 : f32
    %80 = vector.broadcast %cst_30 : f32 to vector<1x16x128xf32>
    %81 = arith.mulf %79, %80 : vector<1x16x128xf32>
    %cst_31 = arith.constant -1.45315206 : f32
    %82 = vector.broadcast %cst_31 : f32 to vector<1x16x128xf32>
    %83 = arith.addf %82, %81 : vector<1x16x128xf32>
    %84 = arith.mulf %79, %83 : vector<1x16x128xf32>
    %cst_32 = arith.constant 1.42141378 : f32
    %85 = vector.broadcast %cst_32 : f32 to vector<1x16x128xf32>
    %86 = arith.addf %85, %84 : vector<1x16x128xf32>
    %87 = arith.mulf %79, %86 : vector<1x16x128xf32>
    %cst_33 = arith.constant -0.284496725 : f32
    %88 = vector.broadcast %cst_33 : f32 to vector<1x16x128xf32>
    %89 = arith.addf %88, %87 : vector<1x16x128xf32>
    %90 = arith.mulf %79, %89 : vector<1x16x128xf32>
    %cst_34 = arith.constant 0.254829586 : f32
    %91 = vector.broadcast %cst_34 : f32 to vector<1x16x128xf32>
    %92 = arith.addf %91, %90 : vector<1x16x128xf32>
    %93 = arith.mulf %79, %92 : vector<1x16x128xf32>
    %cst_35 = arith.constant 0.000000e+00 : f32
    %94 = vector.broadcast %cst_35 : f32 to vector<1x16x128xf32>
    %95 = arith.subf %94, %70 : vector<1x16x128xf32>
    %96 = arith.mulf %95, %70 : vector<1x16x128xf32>
    %97 = math.exp %96 : vector<1x16x128xf32>
    %98 = arith.mulf %93, %97 : vector<1x16x128xf32>
    %cst_36 = arith.constant 1.000000e+00 : f32
    %99 = vector.broadcast %cst_36 : f32 to vector<1x16x128xf32>
    %100 = arith.subf %99, %98 : vector<1x16x128xf32>
    %101 = arith.mulf %69, %100 : vector<1x16x128xf32>
    %cst_37 = arith.constant 1.000000e+00 : f32
    %102 = vector.broadcast %cst_37 : f32 to vector<1x16x128xf32>
    %103 = arith.addf %102, %101 : vector<1x16x128xf32>
    %104 = arith.mulf %62, %103 : vector<1x16x128xf32>
    %105 = vector.shape_cast %104 : vector<1x16x128xf32> to vector<16x128xf32>
    %c1_i32_38 = arith.constant 1 : i32
    %106 = tpu.dynamic_rotate %105 by %c1_i32_38 dim 0 : vector<16x128xf32>, i32 -> vector<16x128xf32>
    %c15_i32_39 = arith.constant 15 : i32
    %107 = tpu.dynamic_rotate %105 by %c15_i32_39 dim 0 : vector<16x128xf32>, i32 -> vector<16x128xf32>
    %108 = tpu.iota {dimensions = array<i32: 0>} : vector<16x128xi32>
    %c16_i32_40 = arith.constant 16 : i32
    %c0_i32_41 = arith.constant 0 : i32
    %109 = arith.cmpi eq, %c16_i32_40, %c0_i32_41 : i32
    %c1_i32_42 = arith.constant 1 : i32
    %110 = arith.select %109, %c1_i32_42, %c16_i32_40 : i32
    %111 = vector.broadcast %110 : i32 to vector<16x128xi32>
    %112 = arith.remsi %108, %111 : vector<16x128xi32>
    %c0_i32_43 = arith.constant 0 : i32
    %113 = vector.broadcast %c0_i32_43 : i32 to vector<16x128xi32>
    %114 = arith.cmpi ne, %112, %113 : vector<16x128xi32>
    %c0_i32_44 = arith.constant 0 : i32
    %115 = vector.broadcast %c0_i32_44 : i32 to vector<16x128xi32>
    %116 = arith.cmpi slt, %112, %115 : vector<16x128xi32>
    %c0_i32_45 = arith.constant 0 : i32
    %117 = arith.cmpi slt, %110, %c0_i32_45 : i32
    %118 = vector.broadcast %117 : i1 to vector<16x128xi1>
    %119 = vector.broadcast %118 : vector<16x128xi1> to vector<16x128xi1>
    %120 = arith.xori %116, %119 : vector<16x128xi1>
    %121 = arith.andi %120, %114 : vector<16x128xi1>
    %122 = vector.broadcast %110 : i32 to vector<16x128xi32>
    %123 = arith.addi %112, %122 : vector<16x128xi32>
    %124 = arith.select %121, %123, %112 : vector<16x128xi1>, vector<16x128xi32>
    %c0_i32_46 = arith.constant 0 : i32
    %125 = vector.broadcast %c0_i32_46 : i32 to vector<16x128xi32>
    %126 = arith.cmpi eq, %124, %125 : vector<16x128xi32>
    %cst_47 = arith.constant 0.000000e+00 : f32
    %127 = vector.broadcast %cst_47 : f32 to vector<16x128xf32>
    %128 = arith.select %126, %127, %106 : vector<16x128xi1>, vector<16x128xf32>
    %c15_i32_48 = arith.constant 15 : i32
    %129 = vector.broadcast %c15_i32_48 : i32 to vector<16x128xi32>
    %130 = arith.cmpi eq, %124, %129 : vector<16x128xi32>
    %cst_49 = arith.constant 0.000000e+00 : f32
    %131 = vector.broadcast %cst_49 : f32 to vector<16x128xf32>
    %132 = arith.select %130, %131, %107 : vector<16x128xi1>, vector<16x128xf32>
    %133 = tpu.concatenate %128, %105, %132 in 1 : vector<16x128xf32>, vector<16x128xf32>, vector<16x128xf32> -> vector<16x384xf32>
    %c0_50 = arith.constant 0 : index
    %c0_51 = arith.constant 0 : index
    %134 = vector.load %arg5[%c0_50, %c0_51] : memref<384x128xf32, #tpu.memory_space<vmem>>, vector<384x128xf32>
    %cst_52 = arith.constant dense<0.000000e+00> : vector<16x128xf32>
    %135 = tpu.matmul %133, %134, %cst_52 {dimension_numbers = #tpu.dot_dimension_numbers<[1], [0], [0], [1], [0, 0, 1, 1], [], []>} : vector<16x384xf32>, vector<384x128xf32>, vector<16x128xf32> -> vector<16x128xf32>
    %136 = vector.shape_cast %135 : vector<16x128xf32> to vector<1x16x128xf32>
    %c0_53 = arith.constant 0 : index
    %c0_54 = arith.constant 0 : index
    %137 = vector.load %arg6[%c0_53, %c0_54] : memref<1x128xf32, #tpu.memory_space<vmem>>, vector<1x128xf32>
    %c0_55 = arith.constant 0 : index
    %c0_56 = arith.constant 0 : index
    %138 = vector.load %arg7[%c0_55, %c0_56] : memref<1x128xf32, #tpu.memory_space<vmem>>, vector<1x128xf32>
    %cst_57 = arith.constant dense<0.000000e+00> : vector<1xf32>
    %139 = vector.multi_reduction <add>, %136, %cst_57 [1, 2] : vector<1x16x128xf32> to vector<1xf32>
    %140 = vector.shape_cast %139 : vector<1xf32> to vector<1x1x1xf32>
    %141 = arith.mulf %136, %136 : vector<1x16x128xf32>
    %cst_58 = arith.constant dense<0.000000e+00> : vector<1xf32>
    %142 = vector.multi_reduction <add>, %141, %cst_58 [1, 2] : vector<1x16x128xf32> to vector<1xf32>
    %143 = vector.shape_cast %142 : vector<1xf32> to vector<1x1x1xf32>
    %cst_59 = arith.constant 4.8828125E-4 : f32
    %144 = vector.broadcast %cst_59 : f32 to vector<1x1x1xf32>
    %145 = arith.mulf %140, %144 : vector<1x1x1xf32>
    %cst_60 = arith.constant 4.8828125E-4 : f32
    %146 = vector.broadcast %cst_60 : f32 to vector<1x1x1xf32>
    %147 = arith.mulf %143, %146 : vector<1x1x1xf32>
    %148 = arith.mulf %145, %145 : vector<1x1x1xf32>
    %149 = arith.subf %147, %148 : vector<1x1x1xf32>
    %cst_61 = arith.constant 0.000000e+00 : f32
    %150 = vector.broadcast %cst_61 : f32 to vector<1x1x1xf32>
    %151 = arith.maximumf %149, %150 : vector<1x1x1xf32>
    %152 = vector.broadcast %145 : vector<1x1x1xf32> to vector<1x16x128xf32>
    %153 = arith.subf %136, %152 : vector<1x16x128xf32>
    %cst_62 = arith.constant 9.99999974E-6 : f32
    %154 = vector.broadcast %cst_62 : f32 to vector<1x1x1xf32>
    %155 = arith.addf %151, %154 : vector<1x1x1xf32>
    %156 = math.rsqrt %155 : vector<1x1x1xf32>
    %157 = vector.broadcast %156 : vector<1x1x1xf32> to vector<1x16x128xf32>
    %158 = arith.mulf %153, %157 : vector<1x16x128xf32>
    %159 = vector.shape_cast %137 : vector<1x128xf32> to vector<1x1x128xf32>
    %160 = vector.broadcast %159 : vector<1x1x128xf32> to vector<1x16x128xf32>
    %161 = arith.mulf %158, %160 : vector<1x16x128xf32>
    %162 = vector.shape_cast %138 : vector<1x128xf32> to vector<1x1x128xf32>
    %163 = vector.broadcast %162 : vector<1x1x128xf32> to vector<1x16x128xf32>
    %164 = arith.addf %161, %163 : vector<1x16x128xf32>
    %c0_63 = arith.constant 0 : index
    %c0_64 = arith.constant 0 : index
    %c0_65 = arith.constant 0 : index
    %165 = vector.load %arg8[%c0_63, %c0_64, %c0_65] : memref<1x16x128xf32, #tpu.memory_space<vmem>>, vector<1x16x128xf32>
    tpu.vector_store %arg8[%c0_63, %c0_64, %c0_65], %164 {strides = array<i32>} : memref<1x16x128xf32, #tpu.memory_space<vmem>>, vector<1x16x128xf32>,
    return
  }
  func.func @transform_0(%arg0: i32) -> (i32, i32, i32) {
    %c0_i32 = arith.constant 0 : i32
    %c0_i32_0 = arith.constant 0 : i32
    %c0_i32_1 = arith.constant 0 : i32
    return %arg0, %c0_i32, %c0_i32_0 : i32, i32, i32
  }
  func.func @transform_1(%arg0: i32) -> (i32, i32) {
    %c0_i32 = arith.constant 0 : i32
    %c0_i32_0 = arith.constant 0 : i32
    %c0_i32_1 = arith.constant 0 : i32
    return %c0_i32, %c0_i32_0 : i32, i32
  }
  func.func @transform_2(%arg0: i32) -> (i32, i32) {
    %c0_i32 = arith.constant 0 : i32
    %c0_i32_0 = arith.constant 0 : i32
    %c0_i32_1 = arith.constant 0 : i32
    return %c0_i32, %c0_i32_0 : i32, i32
  }
  func.func @transform_3(%arg0: i32) -> (i32, i32) {
    %c0_i32 = arith.constant 0 : i32
    %c0_i32_0 = arith.constant 0 : i32
    %c0_i32_1 = arith.constant 0 : i32
    return %c0_i32, %c0_i32_0 : i32, i32
  }
  func.func @transform_4(%arg0: i32) -> (i32, i32) {
    %c0_i32 = arith.constant 0 : i32
    %c0_i32_0 = arith.constant 0 : i32
    %c0_i32_1 = arith.constant 0 : i32
    return %c0_i32, %c0_i32_0 : i32, i32
  }
  func.func @transform_5(%arg0: i32) -> (i32, i32) {
    %c0_i32 = arith.constant 0 : i32
    %c0_i32_0 = arith.constant 0 : i32
    %c0_i32_1 = arith.constant 0 : i32
    return %c0_i32, %c0_i32_0 : i32, i32
  }
  func.func @transform_6(%arg0: i32) -> (i32, i32) {
    %c0_i32 = arith.constant 0 : i32
    %c0_i32_0 = arith.constant 0 : i32
    %c0_i32_1 = arith.constant 0 : i32
    return %c0_i32, %c0_i32_0 : i32, i32
  }
  func.func @transform_7(%arg0: i32) -> (i32, i32, i32) {
    %c0_i32 = arith.constant 0 : i32
    %c0_i32_0 = arith.constant 0 : i32
    %c0_i32_1 = arith.constant 0 : i32
    return %arg0, %c0_i32, %c0_i32_0 : i32, i32, i32
  }
}

</mosaic_0001>

<bundles_post_ra>
// kernel: tpu_custom_call.1
= control target key start
LH: loop header
LB: loop body
LE: loop exit
PB: predicated region body
PF: predicated region fallthrough
CT: control target
= control target key end

     0   :  { %s1689_s0 = inlined_call_operand.hbm [shape: f32[2,16,64], index: 0, kind: input, shape index: {}]   ;;  %s1690_s1 = inlined_call_operand.hbm [shape: f32[192,128], index: 1, kind: input, shape index: {}]   ;;  %s1691_s2 = inlined_call_operand.vmem [shape: f32[1,128], index: 2, kind: input, shape index: {}]   ;;  %s1692_s3 = inlined_call_operand.vmem [shape: f32[1,128], index: 3, kind: input, shape index: {}]   ;;  %s1693_s4 = inlined_call_operand.hbm [shape: f32[384,128], index: 4, kind: input, shape index: {}]   ;;  %s1694_s5 = inlined_call_operand.vmem [shape: f32[1,128], index: 5, kind: input, shape index: {}]   ;;  %s1695_s6 = inlined_call_operand.vmem [shape: f32[1,128], index: 6, kind: input, shape index: {}]   ;;  %s1696_s7 = inlined_call_operand.hbm [shape: f32[2,16,128], index: 7, kind: output, shape index: {}]  }
   0x1   :  { %1703 = sst [smem:[#allocation12_spill]] %s1690_s1 }
   0x2   :  { %12 = vsyncpa [#allocation3], 0 }
   0x3   :  { %14 = vsyncpa [#allocation3 + $0x1], 0 }
   0x4   :  { %15 = vsyncpa [#allocation6], 0 }
   0x5   :  { %16 = vsyncpa [#allocation4], 0 }
   0x6   :  { %18 = vsyncpa [#allocation4 + $0x1], 0  ;;  %s1371_s24 = smov 0   ;;  %s1373_s25 = smov 0  }
   0x7   :  { %s1375_s26 = smov 0   ;;  %s1377_s27 = smov 0  }
   0x8 LB: > { %s1392_s28 = sadd.s32 4294967295, %s1318_s27   ;;  %s963_s29 = sadd.s32 4294967294, %s1318_s27   ;;  %s1318_s27 = sphi %s1377_s27, %s1727_s27   ;;  %s1314_s26 = sphi %s1375_s26, %s1726_s26   ;;  %s1310_s25 = sphi %s1373_s25, %s1725_s25   ;;  %s1306_s24 = sphi %s1371_s24, %s1724_s24  }
   0x9   : > { %p44_p0 = scmp.ne.s32.totalorder %s1310_s25, %s1306_s24  ;;  %p1698_p1 = scmp.eq.s32.totalorder %s1392_s28, 0 }
   0xa   : > { %p194_p2 = scmp.eq.s32.totalorder %s1392_s28, 1  ;;  %p200_p3 = scmp.eq.s32.totalorder %s963_s29, 1 }
   0xb   : > { %p1401_p4 = por %p1698_p1, %p44_p0  ;;  %p964_p5 = scmp.ge.s32.totalorder %s1318_s27, 1 }
   0xc   : > { %p1406_p6 = por %p200_p3, %p44_p0  ;;  %p207_p7 = scmp.lt.s32.totalorder %s1318_s27, 3 }
   0xd   : > { %s1704_s30 = scalar_select %p1401_p4, 1, 0 }
   0xe   : > { %s1705_s8 = scalar_select %p1406_p6, 1, 0 }
   0xf   : > { %p1411_p8 = pnand %p964_p5, %p207_p7  ;;  %s1320_s10 = smov [#allocation5]  }
  0x10   : > { %s219_s11 = sshll.u32 %s1320_s10, 4  ;;  %s1321_s13 = smov [#allocation7]   ;;  %s220_s11 = int_to_ptr.vmem [resolvable:$true] %s219_s11 }
  0x11   : > { %s1706_s9 = scalar_select %p1411_p8, 1, 0 }
  0x12   : > { %p1096_p9 = pneg %p1411_p8  ;;  %s238_s14 = sshll.u32 %s1321_s13, 4  ;;  %s239_s14 = int_to_ptr.vmem [resolvable:$true] %s238_s14 }
  0x13   : > { %s1181_s15 = scalar_lea.vmem %s220_s11, 3072  ;;  %p1189_p5 = scmp.lt.s32.totalorder %s220_s11, %s220_s11 }
  0x14   : > { %p1420_p11 = pnand %p1096_p9, %p1698_p1  ;;  %p1182_p13 = scmp.ne.s32.totalorder %s220_s11, %s1181_s15 }
  0x15   : > { %p1190_p7 = scmp.lt.s32.totalorder %s1181_s15, %s1181_s15 }
  0x16   : > { %p1172_p12 = pneg %p1420_p11 }
  0x17   : > { %p1191_p10 = por %p1190_p7, %p1189_p5 }
  0x18   : > { %p1184_p0 = pnand %p1182_p13, %p1172_p12 }
  0x1a   : > { %p1185_p3 = pneg %p1184_p0 }
  0x1c   : > { %p1192_p9 = pnand %p1191_p10, %p1185_p3 }
  0x1e   : > { %1195 = shalt.err (!%p1192_p9)
}
  0x1f   : > { %s1697_s16 = smov 128   ;;  %s1699_s17 = smov 8  }
  0x20   : > { %s1708_s1 = sld [smem:[#allocation12_spill]]  ;;  %s1207_s20 = scalar_lea.vmem %s239_s14, 6144 }
  0x21   : > { %p1208_p13 = scmp.ne.s32.totalorder %s239_s14, %s1207_s20  ;;  %p1215_p10 = scmp.lt.s32.totalorder %s239_s14, %s239_s14 }
  0x22   : > { %p1216_p3 = scmp.lt.s32.totalorder %s1207_s20, %s1207_s20 }
  0x23   : > { %p1210_p0 = pnand %p1208_p13, %p1172_p12 }
  0x24   : > { %p1217_p7 = por %p1216_p3, %p1215_p10 }
  0x25   : > { %p1211_p5 = pneg %p1210_p0 }
  0x26   : > { %1099 = dma.hbm_to_vmem [thread:$0]  (!%p1420_p11), %s1708_s1, 3072, %s220_s11, [#allocation6], %s1697_s16, %s1697_s16, %s1699_s17  }
  0x27   : > { %p1218_p9 = pnand %p1217_p7, %p1211_p5 }
  0x29   : > { %1221 = shalt.err (!%p1218_p9)
}
  0x2a   : > { %1102 = dma.hbm_to_vmem [thread:$0]  (!%p1420_p11), %s1693_s4, 6144, %s239_s14, [#allocation6], %s1697_s16, %s1697_s16, %s1699_s17  }
  0x2b   : > { %s1449_s23 = sadd.s32 1, %s1318_s27   ;;  %s31_s29 = sadd.s32 1, %s1314_s26 }
  0x2c   : > { %s28_s10 = ssub.s32 %s1318_s27, %s1449_s23  ;;  %p38_p12 = scmp.ne.s32.totalorder %s1314_s26, %s1310_s25 }
  0x2d   : > { %p29_p13 = scmp.eq.s32.totalorder %s28_s10, 0  ;;  %p39_p0 = scmp.eq.s32.totalorder %s1318_s27, 0 }
  0x2e   : > { %p1459_p5 = por %p194_p2, %p38_p12  ;;  %p1113_p10 = scmp.lt.s32.totalorder %s1318_s27, 2 }
  0x2f   : > { %s1465_s12 = scalar_select %p29_p13, %s1314_s26, %s31_s29  }
  0x30   : > { %s1709_s11 = scalar_select %p1459_p5, 1, 0 }
  0x31   : > { %p40_p3 = por %p39_p0, %p38_p12  ;;  %s258_s13 = sand.u32 1, %s1314_s26  }
  0x32   : > { %s968_s15 = sshll.u32 %s258_s13, 4  ;;  %s991_s14 = sshll.u32 %s1318_s27, 8 }
  0x33   : > { %s1472_s20 = scalar_lea.hbm %s1689_s0, %s991_s14  ;;  %s262_s21 = scalar_lea.vmem [#allocation2], %s968_s15 }
  0x34   : > { %s269_s22 = sshll.u32 %s262_s21, 4  ;;  %p1476_p2 = pnand %p1113_p10, %p40_p3  ;;  %s1474_s22 = int_to_ptr.vmem [resolvable:$true] %s269_s22 }
  0x35   : > { %s1480_s29 = scalar_lea.sflag [#allocation3], %s258_s13  ;;  %s1222_s16 = scalar_lea.hbm %s1472_s20, 256 }
  0x36   : > { %p1223_p11 = scmp.ne.s32.totalorder %s1472_s20, %s1222_s16  ;;  %p1224_p7 = pneg %p1476_p2 }
  0x37   : > { %s1227_s15 = scalar_lea.hbm %s1689_s0, 512  ;;  %p1228_p13 = scmp.lt.s32.totalorder %s1472_s20, %s1689_s0 }
  0x38   : > { %p1225_p9 = pnand %p1224_p7, %p1223_p11  ;;  %p1229_p0 = scmp.lt.s32.totalorder %s1227_s15, %s1222_s16 }
  0x3a   : > { %p1226_p12 = pneg %p1225_p9  ;;  %p1230_p10 = por %p1229_p0, %p1228_p13 }
  0x3c   : > { %p1231_p3 = pnand %p1230_p10, %p1226_p12 }
  0x3e   : > { %1234 = shalt.err (!%p1231_p3)
}
  0x3f   : > { %s1235_s13 = scalar_lea.vmem %s1474_s22, 256  ;;  %s1324_s17 = smov [#allocation2]  }
  0x40   : > { %p1236_p1 = scmp.ne.s32.totalorder %s1474_s22, %s1235_s13  ;;  %s1240_s1 = sshll.u32 %s1324_s17, 4  ;;  %s1241_s1 = int_to_ptr.vmem [resolvable:$false] %s1240_s1 }
  0x41   : > { %s1242_s14 = scalar_lea.vmem %s1241_s1, 512  ;;  %p1243_p9 = scmp.lt.s32.totalorder %s1474_s22, %s1241_s1 }
  0x42   : > { %p1238_p6 = pnand %p1236_p1, %p1224_p7  ;;  %p1244_p5 = scmp.lt.s32.totalorder %s1242_s14, %s1235_s13 }
  0x44   : > { %p1239_p11 = pneg %p1238_p6  ;;  %p1245_p4 = por %p1244_p5, %p1243_p9 }
  0x46   : > { %p1246_p8 = pnand %p1245_p4, %p1239_p11 }
  0x48   : > { %1249 = shalt.err (!%p1246_p8)
}
  0x49   : > { %s1711_s16 = smov 8   ;;  %s1712_s18 = smov 128  }
  0x4a   : > { %1106 = dma.hbm_to_vmem [thread:$0]  (!%p1476_p2), %s1472_s20, 256, %s1474_s22, %s1480_s29, %s1712_s18, %s1712_s18, %s1711_s16  }
  0x4b   : > { %p1713_p1 = scmp.ne.s32.totalorder %s1706_s9, 0 }
  0x4c   : > { %s1507_s17 = sand.u32 (!%p1713_p1), 1, %s1310_s25   ;;  %p1714_p4 = scmp.ne.s32.totalorder (!%p1713_p1), %s1704_s30, 0 }
  0x4d   : > { %281 = sbr.rel (%p1713_p1) target bundleno = 1070 (0x42e), region = 48  ;;  %s972_s1 = sshll.u32 (!%p1713_p1), %s1507_s17, 4 }
  0x4e   : > { %s284_s15 = scalar_lea.sflag (!%p1713_p1), [#allocation3], %s1507_s17  ;;  %s287_s10 = scalar_lea.vmem (!%p1713_p1), [#allocation2], %s972_s1 }
  0x52   : > { %1293 = dma.done.wait (%p1714_p4), %s284_s15, 256  }
  0x53   : > { %1295 = vsyncadd (%p1714_p4), %s284_s15, 4294967040  ;;  %p1715_p6 = scmp.eq.s32.totalorder %s1392_s28, 0 }
  0x55   : > { %1297 = dma.done.wait (%p1715_p6), [#allocation6], 9216   ;;  %p1716_p8 = pmov %p1715_p6 }
  0x56   : > { %v330_v0 = vlaneseq  ;;  %v1325_v1 = vmov 0.0   ;;  %v326_v5 = vld [vmem:[%s287_s10] sm:$0xff]  ;;  %v327_v6 = vld [vmem:[%s287_s10 + $0x8] sm:$0xff]  ;;  %vm381_vm1 = vcmask 523264   ;;  %s1326_s30 = smov 64   ;;  %s992_s13 = sshll.u32 %s1392_s28, 8 }
  0x57   : > { %1299 = vsyncadd (%p1716_p8), [#allocation6], 4294958080  ;;  %414 = vmatprep.subr.mxu0 %v1325_v1  ;;  %v399_v7 = vld [vmem:[#allocation5 + $0x78] sm:$0xff]  ;;  %375 = vrot.lane.b32.xlu0 %v326_v5, %s1326_s30  ;;  %v328_v8 = vrot.slane %v326_v5, 7  ;;  %v335_v9 = vrot.slane %v326_v5, 1  ;;  %v329_v10 = vrot.slane %v327_v6, 7  ;;  %s1644_s9 = scalar_lea.hbm %s1696_s7, %s992_s13 }
  0x58   : > { %v1522_v2 = vshrl.u32 %v330_v0, 7  ;;  %v336_v11 = vrot.slane %v327_v6, 1  ;;  %415 = vmatpush1.msra.mxu0 %v399_v7  ;;  %v398_v12 = vld [vmem:[#allocation5 + $0x70] sm:$0xff]  ;;  %v397_v13 = vld [vmem:[#allocation5 + $0x68] sm:$0xff]  ;;  %v396_v19 = vld [vmem:[#allocation5 + $0x60] sm:$0xff]  ;;  %s325_s14 = scalar_lea.vmem [#allocation8], %s972_s1 }
  0x59   : > { %416 = vmatprep.subr.mxu0 %v1325_v1  ;;  %v395_v21 = vld [vmem:[#allocation5 + $0x58] sm:$0xff]  ;;  %v394_v22 = vld [vmem:[#allocation5 + $0x50] sm:$0xff]  ;;  %v393_v23 = vld [vmem:[#allocation5 + $0x48] sm:$0xff]  ;;  %s871_s16 = sshll.u32 %s325_s14, 4  ;;  %s858_s28 = scalar_lea.sflag [#allocation4], %s1507_s17  ;;  %s1646_s16 = int_to_ptr.vmem [resolvable:$true] %s871_s16 }
  0x5a   : > { %v340_v3 = vadd.s32 8, %v1522_v2  ;;  %vm337_vm0 = vcmp.lt.s32.totalorder %v1522_v2, 7  ;;  %vm332_vm2 = vcmp.lt.s32.totalorder %v1522_v2, 1  ;;  %417 = vmatpush1.msra.mxu0 %v398_v12  ;;  %v392_v24 = vld [vmem:[#allocation5 + $0x40] sm:$0xff]  ;;  %v391_v25 = vld [vmem:[#allocation5 + $0x38] sm:$0xff]  ;;  %v390_v26 = vld [vmem:[#allocation5 + $0x30] sm:$0xff] }
  0x5b   : > { %v338_v15 = vsel %vm337_vm0, %v335_v9, %v336_v11  ;;  %v1536_v16 = vsel %vm332_vm2, %v329_v10, %v328_v8  ;;  %v1540_v17 = vsel %vm337_vm0, %v336_v11, %v335_v9  ;;  %v1544_v18 = vsel %vm332_vm2, %v328_v8, %v329_v10  ;;  %418 = vmatprep.subr.mxu0 %v1325_v1  ;;  %v389_v27 = vld [vmem:[#allocation5 + $0x28] sm:$0xff]  ;;  %v388_v28 = vld [vmem:[#allocation5 + $0x20] sm:$0xff]  ;;  %v387_v29 = vld [vmem:[#allocation5 + $0x18] sm:$0xff]  ;;  %s1250_s1 = scalar_lea.vmem %s1646_s16, 256  ;;  %p1721_p2 = scmp.ne.s32.totalorder %s1709_s11, 0 }
  0x5c   : > { %v352_v4 = vand.u32 15, %v340_v3  ;;  %976 = vmatprep.mubr.msk.f32.mxu0 %vm381_vm1, %v338_v15  ;;  %377 = vrot.lane.b32.xlu0 %v327_v6, %s1326_s30  ;;  %v386_v30 = vld [vmem:[#allocation5 + $0x10] sm:$0xff]  ;;  %v385_v31 = vld [vmem:[#allocation5 + $0x8] sm:$0xff]  ;;  %v384_v32 = vld [vmem:[#allocation5] sm:$0xff]  ;;  %v345_v41 = vand.u32 15, %v1522_v2  ;;  %p1251_p5 = scmp.ne.s32.totalorder %s1646_s16, %s1250_s1  ;;  %s1328_s20 = smov [#allocation8]  }
  0x5d   : > { %419 = vmatpush1.msra.mxu0 %v397_v13  ;;  %v407_v33 = vld [vmem:[#allocation5 + $0xb8] sm:$0xff]  ;;  %v406_v34 = vld [vmem:[#allocation5 + $0xb0] sm:$0xff]  ;;  %v405_v35 = vld [vmem:[#allocation5 + $0xa8] sm:$0xff]  ;;  %s1254_s22 = sshll.u32 %s1328_s20, 4  ;;  %s1255_s22 = int_to_ptr.vmem [resolvable:$false] %s1254_s22 }
  0x5e   : > { %vm1528_vm3 = vcmp.eq.s32.totalorder %v352_v4, 15  ;;  %420 = vmatprep.subr.mxu0 %v1325_v1  ;;  %v404_v36 = vld [vmem:[#allocation5 + $0xa0] sm:$0xff]  ;;  %v403_v37 = vld [vmem:[#allocation5 + $0x98] sm:$0xff]  ;;  %v402_v38 = vld [vmem:[#allocation5 + $0x90] sm:$0xff]  ;;  %vm1573_vm4 = vcmp.eq.s32.totalorder %v345_v41, 0  ;;  %p1252_p7 = pnand %p1251_p5, %p1721_p2  ;;  %s1256_s29 = scalar_lea.vmem %s1255_s22, 512 }
  0x5f   : > { %v372_v20 = vsel %vm1528_vm3, 0.0, %v1540_v17  ;;  %421 = vmatpush1.msra.mxu0 %v396_v19  ;;  %v401_v39 = vld [vmem:[#allocation5 + $0x88] sm:$0xff]  ;;  %v400_v40 = vld [vmem:[#allocation5 + $0x80] sm:$0xff]  ;;  %v367_v43 = vsel %vm1573_vm4, 0.0, %v1536_v16  ;;  %v639_v56 = vld [vmem:[#allocation7 + $0xf8] sm:$0xff]  ;;  %p1257_p13 = scmp.lt.s32.totalorder %s1646_s16, %s1255_s22  ;;  %p1258_p0 = scmp.lt.s32.totalorder %s1256_s29, %s1250_s1 }
  0x60   : > { %422 = vmatprep.subr.mxu0 %v1325_v1  ;;  %v623_v57 = vld [vmem:[#allocation7 + $0x78] sm:$0xff]  ;;  %v638_v58 = vld [vmem:[#allocation7 + $0xf0] sm:$0xff]  ;;  %993 = vmatprep.subr.mxu1 %v639_v56  ;;  %v637_v60 = vld [vmem:[#allocation7 + $0xe8] sm:$0xff]  ;;  %p1253_p12 = pneg %p1252_p7 }
  0x61   : > { %423 = vmatpush1.msra.mxu0 %v395_v21  ;;  %v622_v59 = vld [vmem:[#allocation7 + $0x70] sm:$0xff]  ;;  %994 = vmatpush3.msra.mxu1 %v623_v57  ;;  %v621_v61 = vld [vmem:[#allocation7 + $0x68] sm:$0xff]  ;;  %v636_v62 = vld [vmem:[#allocation7 + $0xe0] sm:$0xff]  ;;  %p1259_p10 = por %p1258_p0, %p1257_p13 }
  0x62   : > { %424 = vmatprep.subr.mxu0 %v1325_v1  ;;  %995 = vmatprep.subr.mxu1 %v638_v58  ;;  %v620_v63 = vld [vmem:[#allocation7 + $0x60] sm:$0xff]  ;;  %v635_v0 = vld [vmem:[#allocation7 + $0xd8] sm:$0xff]  ;;  %v634_v3 = vld [vmem:[#allocation7 + $0xd0] sm:$0xff] }
  0x63   : > { %425 = vmatpush1.msra.mxu0 %v394_v22  ;;  %996 = vmatpush3.msra.mxu1 %v622_v59  ;;  %v618_v4 = vld [vmem:[#allocation7 + $0x50] sm:$0xff]  ;;  %v633_v5 = vld [vmem:[#allocation7 + $0xc8] sm:$0xff]  ;;  %v632_v7 = vld [vmem:[#allocation7 + $0xc0] sm:$0xff]  ;;  %p1260_p3 = pnand %p1259_p10, %p1253_p12 }
  0x64   : > { %426 = vmatprep.subr.mxu0 %v1325_v1  ;;  %997 = vmatprep.subr.mxu1 %v637_v60  ;;  %v617_v6 = vld [vmem:[#allocation7 + $0x48] sm:$0xff]  ;;  %v616_v8 = vld [vmem:[#allocation7 + $0x40] sm:$0xff]  ;;  %v631_v9 = vld [vmem:[#allocation7 + $0xb8] sm:$0xff] }
  0x65   : > { %427 = vmatpush1.msra.mxu0 %v393_v23  ;;  %998 = vmatpush3.msra.mxu1 %v621_v61  ;;  %v615_v10 = vld [vmem:[#allocation7 + $0x38] sm:$0xff]  ;;  %v630_v11 = vld [vmem:[#allocation7 + $0xb0] sm:$0xff]  ;;  %v629_v13 = vld [vmem:[#allocation7 + $0xa8] sm:$0xff] }
  0x66   : > { %428 = vmatprep.subr.mxu0 %v1325_v1  ;;  %999 = vmatprep.subr.mxu1 %v636_v62  ;;  %v614_v12 = vld [vmem:[#allocation7 + $0x30] sm:$0xff]  ;;  %v613_v15 = vld [vmem:[#allocation7 + $0x28] sm:$0xff]  ;;  %v628_v16 = vld [vmem:[#allocation7 + $0xa0] sm:$0xff] }
  0x67   : > { %429 = vmatpush1.msra.mxu0 %v392_v24  ;;  %1000 = vmatpush3.msra.mxu1 %v620_v63  ;;  %v612_v17 = vld [vmem:[#allocation7 + $0x20] sm:$0xff]  ;;  %v611_v19 = vld [vmem:[#allocation7 + $0x18] sm:$0xff]  ;;  %v610_v21 = vld [vmem:[#allocation7 + $0x10] sm:$0xff] }
  0x68   : > { %430 = vmatprep.subr.mxu0 %v1325_v1  ;;  %1001 = vmatprep.subr.mxu1 %v635_v0  ;;  %v625_v22 = vld [vmem:[#allocation7 + $0x88] sm:$0xff]  ;;  %v624_v24 = vld [vmem:[#allocation7 + $0x80] sm:$0xff]  ;;  %vm980_vm7 = vmneg %vm1573_vm4 }
  0x69   : > { %431 = vmatpush1.msra.mxu0 %v391_v25  ;;  %v609_v23 = vld [vmem:[#allocation7 + $0x8] sm:$0xff]  ;;  %v608_v25 = vld [vmem:[#allocation7] sm:$0xff]  ;;  %vm982_vm8 = vmneg %vm1528_vm3 }
  0x6a   : > { %432 = vmatprep.subr.mxu0 %v1325_v1  ;;  %v979_v56 = vld [vmem:[%s1692_s3] ss:$0 sm:$0xff] }
  0x6b   : > { %433 = vmatpush1.msra.mxu0 %v390_v26  ;;  %v1598_v26 = vld [vmem:[#allocation7 + $0x178] sm:$0xff] }
  0x6c   : > { %434 = vmatprep.subr.mxu0 %v1325_v1 }
  0x6d   : > { %435 = vmatpush1.msra.mxu0 %v389_v27 }
  0x6e   : > { %436 = vmatprep.subr.mxu0 %v1325_v1 }
  0x6f   : > { %437 = vmatpush1.msra.mxu0 %v388_v28 }
  0x70   : > { %438 = vmatprep.subr.mxu0 %v1325_v1 }
  0x71   : > { %439 = vmatpush1.msra.mxu0 %v387_v29 }
  0x72   : > { %440 = vmatprep.subr.mxu0 %v1325_v1 }
  0x73   : > { %441 = vmatpush1.msra.mxu0 %v386_v30 }
  0x74   : > { %442 = vmatprep.subr.mxu0 %v1325_v1 }
  0x75   : > { %443 = vmatpush1.msra.mxu0 %v385_v31 }
  0x76   : > { %444 = vmatprep.subr.mxu0 %v1325_v1 }
  0x77   : > { %445 = vmatpush1.msra.mxu0 %v384_v32 }
  0x78   : > { %462 = vmatprep.subr.mxu0 %v1325_v1 }
  0x79   : > { %463 = vmatpush2.msra.mxu0 %v407_v33 }
  0x7a   : > { %464 = vmatprep.subr.mxu0 %v1325_v1 }
  0x7b   : > { %465 = vmatpush2.msra.mxu0 %v406_v34 }
  0x7c   : > { %466 = vmatprep.subr.mxu0 %v1325_v1 }
  0x7d   : > { %467 = vmatpush2.msra.mxu0 %v405_v35 }
  0x7e   : > { %468 = vmatprep.subr.mxu0 %v1325_v1 }
  0x7f   : > { %469 = vmatpush2.msra.mxu0 %v404_v36 }
  0x80   : > { %470 = vmatprep.subr.mxu0 %v1325_v1 }
  0x81   : > { %471 = vmatpush2.msra.mxu0 %v403_v37 }
  0x82   : > { %472 = vmatprep.subr.mxu0 %v1325_v1 }
  0x83   : > { %473 = vmatpush2.msra.mxu0 %v402_v38 }
  0x84   : > { %474 = vmatprep.subr.mxu0 %v1325_v1 }
  0x85   : > { %475 = vmatpush2.msra.mxu0 %v401_v39 }
  0x86   : > { %476 = vmatprep.subr.mxu0 %v1325_v1  ;;  %v619_v1 = vld [vmem:[#allocation7 + $0x58] sm:$0xff] }
  0x87   : > { %477 = vmatpush2.msra.mxu0 %v400_v40  ;;  %1002 = vmatpush3.msra.mxu1 %v619_v1 }
  0x88   : > { %1003 = vmatprep.subr.mxu1 %v634_v3 }
  0x89   : > { %1004 = vmatpush3.msra.mxu1 %v618_v4 }
  0x8a   : > { %1005 = vmatprep.subr.mxu1 %v633_v5 }
  0x8b   : > { %1006 = vmatpush3.msra.mxu1 %v617_v6 }
  0x8c   : > { %1007 = vmatprep.subr.mxu1 %v632_v7 }
  0x8d   : > { %1008 = vmatpush3.msra.mxu1 %v616_v8 }
  0x8e   : > { %1009 = vmatprep.subr.mxu1 %v631_v9 }
  0x8f   : > { %1010 = vmatpush3.msra.mxu1 %v615_v10 }
  0x90   : > { %1011 = vmatprep.subr.mxu1 %v630_v11 }
  0x91   : > { %1012 = vmatpush3.msra.mxu1 %v614_v12 }
  0x92   : > { %1013 = vmatprep.subr.mxu1 %v629_v13 }
  0x93   : > { %1014 = vmatpush3.msra.mxu1 %v613_v15 }
  0x94   : > { %1015 = vmatprep.subr.mxu1 %v628_v16 }
  0x95   : > { %1016 = vmatpush3.msra.mxu1 %v612_v17 }
  0xc9   : > { %v376_v44 = vpop.permute.xlu0 %375 }
  0xca   : > { %v382_v45 = vsel %vm381_vm1, %v367_v43, %v376_v44 }
  0xcb   : > { %479 = vmatmul.mubr.f32.vlgmr.msra.gmra.mxu0 %v382_v45 }
  0xcc   : > { %977 = vmatprep.mubr.msk.f32.mxu0 %vm381_vm1, %v372_v20  ;;  %v626_v20 = vld [vmem:[#allocation7 + $0x90] sm:$0xff] }
  0xce   : > { %v378_v46 = vpop.permute.xlu0 %377 }
  0xcf   : > { %v383_v47 = vsel %vm381_vm1, %v1544_v18, %v378_v46  ;;  %v627_v18 = vld [vmem:[#allocation7 + $0x98] sm:$0xff] }
  0xd0   : > { %484 = vmatmul.mubr.f32.gmra.mxu0 %v383_v47  ;;  %1017 = vmatprep.subr.mxu1 %v627_v18 }
  0xd1   : > { %1018 = vmatpush3.msra.mxu1 %v611_v19 }
  0xd2   : > { %1019 = vmatprep.subr.mxu1 %v626_v20 }
  0xd3   : > { %1020 = vmatpush3.msra.mxu1 %v610_v21 }
  0xd4   : > { %1021 = vmatprep.subr.mxu1 %v625_v22 }
  0xd5   : > { %1022 = vmatpush3.msra.mxu1 %v609_v23 }
  0xd6   : > { %1023 = vmatprep.subr.mxu1 %v624_v24 }
  0xd7   : > { %1024 = vmatpush3.msra.mxu1 %v608_v25 }
  0xd8   : > { %1049 = vmatprep.subr.mxu1 %v1598_v26 }
 0x18b   : > { %v1588_v48 = vpop.f32.mrf.mxu0 }
 0x18c   : > { %v500_v54 = vmul.f32 %v1588_v48, %v1588_v48 }
 0x18d   : > { %v482_v49 = vpop.f32.mrf.mxu0 }
 0x190   : > { %v1590_v50 = vpop.f32.mrf.mxu0 }
 0x191   : > { %v491_v51 = vadd.f32 %v1590_v50, %v1588_v48  ;;  %v501_v52 = vmul.f32 %v1590_v50, %v1590_v50 }
 0x192   : > { %v487_v53 = vpop.f32.mrf.mxu0 }
 0x193   : > { %492 = vadd.xlane.f32.xlu1 %v491_v51  ;;  %v502_v55 = vadd.f32 %v501_v52, %v500_v54  ;;  %v978_v53 = vld [vmem:[%s1691_s2] ss:$0 sm:$0xff] }
 0x197   : > { %503 = vadd.xlane.f32.xlu1 %v502_v55 }
 0x21c   : > { %v493_v27 = vpop.xlane.xlu1 %492 }
 0x21d   : > { %v494_v28 = vrot.slane %v493_v27, 4 }
 0x21f   : > { %v495_v29 = vadd.f32 %v494_v28, %v493_v27 }
 0x220   : > { %v504_v30 = vpop.xlane.xlu1 %503 }
 0x221   : > { %v496_v31 = vrot.slane %v495_v29, 2  ;;  %v505_v32 = vrot.slane %v504_v30, 4 }
 0x223   : > { %v497_v33 = vadd.f32 %v496_v31, %v495_v29  ;;  %v506_v34 = vadd.f32 %v505_v32, %v504_v30 }
 0x225   : > { %v498_v35 = vrot.slane %v497_v33, 1  ;;  %v507_v36 = vrot.slane %v506_v34, 2 }
 0x227   : > { %v499_v37 = vadd.f32 %v498_v35, %v497_v33  ;;  %v508_v38 = vadd.f32 %v507_v36, %v506_v34 }
 0x229   : > { %v511_v39 = vmul.f32 0.00048828125, %v499_v37  ;;  %v509_v40 = vrot.slane %v508_v38, 1 }
 0x22b   : > { %v510_v41 = vadd.f32 %v509_v40, %v508_v38  ;;  %v513_v43 = vmul.f32 %v511_v39, %v511_v39  ;;  %v516_v49 = vsub.f32 %v1588_v48, %v511_v39  ;;  %v517_v51 = vsub.f32 %v1590_v50, %v511_v39 }
 0x22d   : > { %v512_v44 = vmul.f32 0.00048828125, %v510_v41 }
 0x22f   : > { %v514_v45 = vsub.f32 %v512_v44, %v513_v43  ;;  %v1327_v44 = vmov -1.0  }
 0x231   : > { %v515_v46 = vmax.f32 %v514_v45, 0.0 }
 0x233   : > { %v518_v47 = vadd.f32 1e-05, %v515_v46 }
 0x235   : > { %1158 = vrsqrt.f32 %v518_v47 }
 0x242   : > { %v1159_v52 = vpop.eup %1158 }
 0x243   : > { %v520_v54 = vmul.f32 %v1159_v52, %v516_v49  ;;  %v521_v55 = vmul.f32 %v1159_v52, %v517_v51 }
 0x245   : > { %v528_v57 = vmul.f32 %v978_v53, %v520_v54  ;;  %v529_v58 = vmul.f32 %v978_v53, %v521_v55 }
 0x247   : > { %v536_v59 = vadd.f32 %v979_v56, %v528_v57  ;;  %v537_v60 = vadd.f32 %v979_v56, %v529_v58 }
 0x249   : > { %v540_v61 = vmul.f32 0.70710677, %v536_v59  ;;  %v541_v62 = vmul.f32 0.70710677, %v537_v60  ;;  %v538_v52 = vmul.f32 0.5, %v536_v59  ;;  %v539_v54 = vmul.f32 0.5, %v537_v60 }
 0x24a   : > { %v654_v59 = vld [vmem:[#allocation7 + $0x170] sm:$0xff] }
 0x24b   : > { %v546_v48 = vand.u32 2147483647, %v540_v61  ;;  %v547_v63 = vand.u32 2147483647, %v541_v62  ;;  %vm542_vm5 = vcmp.ge.f32.partialorder %v540_v61, 0.0  ;;  %vm543_vm6 = vcmp.ge.f32.partialorder %v541_v62, 0.0 }
 0x24c   : > { %v544_v45 = vsel %vm542_vm5, 1.0, %v1327_v44  ;;  %v545_v47 = vsel %vm543_vm6, 1.0, %v1327_v44 }
 0x24d   : > { %v548_v50 = vmul.f32 0.3275911, %v546_v48  ;;  %v549_v0 = vmul.f32 0.3275911, %v547_v63  ;;  %v578_v4 = vsub.f32 0.0, %v546_v48  ;;  %v579_v6 = vsub.f32 0.0, %v547_v63 }
 0x24f   : > { %v550_v1 = vadd.f32 1.0, %v548_v50  ;;  %v551_v3 = vadd.f32 1.0, %v549_v0  ;;  %v580_v11 = vmul.f32 %v578_v4, %v546_v48  ;;  %v581_v13 = vmul.f32 %v579_v6, %v547_v63  ;;  %v653_v63 = vld [vmem:[#allocation7 + $0x168] sm:$0xff]  ;;  %v652_v50 = vld [vmem:[#allocation7 + $0x160] sm:$0xff]  ;;  %v646_v6 = vld [vmem:[#allocation7 + $0x130] sm:$0xff] }
 0x250   : > { %v648_v4 = vld [vmem:[#allocation7 + $0x140] sm:$0xff] }
 0x251   : > { %1160 = vrcp.f32 %v550_v1  ;;  %v582_v18 = vmul.f32 1.442695, %v580_v11  ;;  %v584_v20 = vmul.f32 1.442695, %v581_v13  ;;  %v641_v11 = vld [vmem:[#allocation7 + $0x108] sm:$0xff] }
 0x252   : > { %1162 = vrcp.f32 %v551_v3 }
 0x253   : > { %1164 = vpow2.f32 %v582_v18 }
 0x254   : > { %1166 = vpow2.f32 %v584_v20 }
 0x25e   : > { %v1161_v5 = vpop.eup %1160 }
 0x25f   : > { %v1163_v7 = vpop.eup %1162  ;;  %v554_v8 = vmul.f32 %v1161_v5, %v550_v1  ;;  %v651_v1 = vld [vmem:[#allocation7 + $0x158] sm:$0xff] }
 0x260   : > { %v555_v9 = vmul.f32 %v1163_v7, %v551_v3  ;;  %v1165_v37 = vpop.eup %1164  ;;  %v649_v3 = vld [vmem:[#allocation7 + $0x148] sm:$0xff] }
 0x261   : > { %v556_v10 = vsub.f32 2.0, %v554_v8  ;;  %v1167_v39 = vpop.eup %1166  ;;  %v644_v8 = vld [vmem:[#allocation7 + $0x120] sm:$0xff] }
 0x262   : > { %v557_v12 = vsub.f32 2.0, %v555_v9  ;;  %v643_v9 = vld [vmem:[#allocation7 + $0x118] sm:$0xff] }
 0x263   : > { %v558_v15 = vmul.f32 %v1161_v5, %v556_v10  ;;  %v647_v5 = vld [vmem:[#allocation7 + $0x138] sm:$0xff]  ;;  %v642_v10 = vld [vmem:[#allocation7 + $0x110] sm:$0xff] }
 0x264   : > { %v559_v16 = vmul.f32 %v1163_v7, %v557_v12  ;;  %v645_v7 = vld [vmem:[#allocation7 + $0x128] sm:$0xff]  ;;  %v640_v12 = vld [vmem:[#allocation7 + $0x100] sm:$0xff] }
 0x265   : > { %v560_v17 = vmul.f32 1.0614054, %v558_v15 }
 0x266   : > { %v561_v19 = vmul.f32 1.0614054, %v559_v16 }
 0x267   : > { %v562_v21 = vadd.f32 -1.4531521, %v560_v17 }
 0x268   : > { %v563_v22 = vadd.f32 -1.4531521, %v561_v19 }
 0x269   : > { %v564_v23 = vmul.f32 %v562_v21, %v558_v15 }
 0x26a   : > { %v565_v24 = vmul.f32 %v563_v22, %v559_v16 }
 0x26b   : > { %v566_v25 = vadd.f32 1.4214138, %v564_v23 }
 0x26c   : > { %v567_v27 = vadd.f32 1.4214138, %v565_v24 }
 0x26d   : > { %v568_v28 = vmul.f32 %v566_v25, %v558_v15 }
 0x26e   : > { %v569_v29 = vmul.f32 %v567_v27, %v559_v16 }
 0x26f   : > { %v570_v30 = vadd.f32 -0.28449672, %v568_v28 }
 0x270   : > { %v571_v31 = vadd.f32 -0.28449672, %v569_v29 }
 0x271   : > { %v572_v32 = vmul.f32 %v570_v30, %v558_v15 }
 0x272   : > { %v573_v33 = vmul.f32 %v571_v31, %v559_v16 }
 0x273   : > { %v574_v34 = vadd.f32 0.2548296, %v572_v32 }
 0x274   : > { %v575_v35 = vadd.f32 0.2548296, %v573_v33 }
 0x275   : > { %v576_v36 = vmul.f32 %v574_v34, %v558_v15 }
 0x276   : > { %v577_v38 = vmul.f32 %v575_v35, %v559_v16 }
 0x277   : > { %v586_v40 = vmul.f32 %v1165_v37, %v576_v36 }
 0x278   : > { %v587_v41 = vmul.f32 %v1167_v39, %v577_v38 }
 0x279   : > { %v588_v43 = vsub.f32 1.0, %v586_v40 }
 0x27a   : > { %v589_v46 = vsub.f32 1.0, %v587_v41 }
 0x27b   : > { %v590_v49 = vmul.f32 %v588_v43, %v544_v45 }
 0x27c   : > { %v591_v51 = vmul.f32 %v589_v46, %v545_v47 }
 0x27d   : > { %v592_v53 = vadd.f32 1.0, %v590_v49 }
 0x27e   : > { %v593_v55 = vadd.f32 1.0, %v591_v51 }
 0x27f   : > { %v1609_v56 = vmul.f32 %v592_v53, %v538_v52 }
 0x280   : > { %v1611_v57 = vmul.f32 %v593_v55, %v539_v54  ;;  %v984_v54 = vld [vmem:[%s1694_s5] ss:$0 sm:$0xff] }
 0x281   : > { %720 = vmatprep.mubr.f32.mxu1 %v1609_v56  ;;  %v596_v58 = vrot.slane %v1609_v56, 7  ;;  %v600_v60 = vrot.slane %v1609_v56, 1 }
 0x282   : > { %v597_v61 = vrot.slane %v1611_v57, 7  ;;  %v601_v48 = vrot.slane %v1611_v57, 1 }
 0x284   : > { %v599_v62 = vsel %vm332_vm2, %v597_v61, %v596_v58  ;;  %v598_v42 = vsel %vm332_vm2, %v596_v58, %v597_v61  ;;  %v602_v0 = vsel %vm337_vm0, %v600_v60, %v601_v48  ;;  %v603_v13 = vsel %vm337_vm0, %v601_v48, %v600_v60 }
 0x285   : > { %981 = vmatmul.mubr.msk.f32.vlgmr.msra.gmra.mxu1 %vm980_vm7, %v599_v62 }
 0x286   : > { %1050 = vmatpush3.msra.mxu1 %v1598_v26  ;;  %725 = vmatprep.mubr.f32.mxu1 %v1611_v57  ;;  %v650_v26 = vld [vmem:[#allocation7 + $0x150] sm:$0xff]  ;;  %v985_v57 = vld [vmem:[%s1695_s6] ss:$0 sm:$0xff] }
 0x287   : > { %1051 = vmatprep.subr.mxu1 %v654_v59 }
 0x288   : > { %1052 = vmatpush3.msra.mxu1 %v654_v59 }
 0x289   : > { %1053 = vmatprep.subr.mxu1 %v653_v63  ;;  %726 = vmatmul.mubr.f32.gmra.mxu1 %v598_v42 }
 0x28a   : > { %1054 = vmatpush3.msra.mxu1 %v653_v63  ;;  %1081 = vmatprep.mubr.f32.mxu1 %v602_v0 }
 0x28b   : > { %1055 = vmatprep.subr.mxu1 %v652_v50 }
 0x28c   : > { %1056 = vmatpush3.msra.mxu1 %v652_v50 }
 0x28d   : > { %1057 = vmatprep.subr.mxu1 %v651_v1 }
 0x28e   : > { %1058 = vmatpush3.msra.mxu1 %v651_v1 }
 0x28f   : > { %1059 = vmatprep.subr.mxu1 %v650_v26 }
 0x290   : > { %1060 = vmatpush3.msra.mxu1 %v650_v26 }
 0x291   : > { %1061 = vmatprep.subr.mxu1 %v649_v3 }
 0x292   : > { %1062 = vmatpush3.msra.mxu1 %v649_v3 }
 0x293   : > { %1063 = vmatprep.subr.mxu1 %v648_v4 }
 0x294   : > { %1064 = vmatpush3.msra.mxu1 %v648_v4 }
 0x295   : > { %1065 = vmatprep.subr.mxu1 %v647_v5 }
 0x296   : > { %1066 = vmatpush3.msra.mxu1 %v647_v5 }
 0x297   : > { %1067 = vmatprep.subr.mxu1 %v646_v6 }
 0x298   : > { %1068 = vmatpush3.msra.mxu1 %v646_v6 }
 0x299   : > { %1069 = vmatprep.subr.mxu1 %v645_v7 }
 0x29a   : > { %1070 = vmatpush3.msra.mxu1 %v645_v7 }
 0x29b   : > { %1071 = vmatprep.subr.mxu1 %v644_v8 }
 0x29c   : > { %1072 = vmatpush3.msra.mxu1 %v644_v8 }
 0x29d   : > { %1073 = vmatprep.subr.mxu1 %v643_v9 }
 0x29e   : > { %1074 = vmatpush3.msra.mxu1 %v643_v9 }
 0x29f   : > { %1075 = vmatprep.subr.mxu1 %v642_v10 }
 0x2a0   : > { %1076 = vmatpush3.msra.mxu1 %v642_v10 }
 0x2a1   : > { %1077 = vmatprep.subr.mxu1 %v641_v11 }
 0x2a2   : > { %1078 = vmatpush3.msra.mxu1 %v641_v11 }
 0x2a3   : > { %1079 = vmatprep.subr.mxu1 %v640_v12 }
 0x2a4   : > { %1080 = vmatpush3.msra.mxu1 %v640_v12 }
 0x2a5   : > { %1082 = vmatmul.mubr.msk.f32.vlgmr.msra.gmra.mxu1 %vm982_vm8, %v603_v13 }
 0x345   : > { %v1025_v15 = vpop.f32.mrf.mxu1 }
 0x347   : > { %v1026_v16 = vpop.f32.mrf.mxu1 }
 0x348   : > { %v1027_v21 = vadd.f32 %v1026_v16, %v1025_v15 }
 0x349   : > { %v1028_v17 = vpop.f32.mrf.mxu1 }
 0x34b   : > { %v1029_v18 = vpop.f32.mrf.mxu1 }
 0x34c   : > { %v1030_v19 = vadd.f32 %v1029_v18, %v1028_v17 }
 0x365   : > { %v1083_v20 = vpop.f32.mrf.mxu1 }
 0x366   : > { %v803_v22 = vadd.f32 %v1083_v20, %v1030_v19 }
 0x367   : > { %v797_v23 = vpop.f32.mrf.mxu1 }
 0x368   : > { %v798_v24 = vadd.f32 %v1027_v21, %v797_v23  ;;  %v818_v27 = vmul.f32 %v803_v22, %v803_v22 }
 0x36a   : > { %v808_v25 = vadd.f32 %v803_v22, %v798_v24  ;;  %v817_v14 = vmul.f32 %v798_v24, %v798_v24 }
 0x36c   : > { %809 = vadd.xlane.f32.xlu0 %v808_v25  ;;  %v819_v28 = vadd.f32 %v818_v27, %v817_v14 }
 0x36e   : > { %820 = vadd.xlane.f32.xlu1 %v819_v28 }
 0x3f5   : > { %v810_v29 = vpop.xlane.xlu0 %809 }
 0x3f6   : > { %v811_v2 = vrot.slane %v810_v29, 4 }
 0x3f7   : > { %v821_v30 = vpop.xlane.xlu1 %820 }
 0x3f8   : > { %v812_v31 = vadd.f32 %v811_v2, %v810_v29  ;;  %v822_v32 = vrot.slane %v821_v30, 4 }
 0x3fa   : > { %v813_v33 = vrot.slane %v812_v31, 2  ;;  %v823_v34 = vadd.f32 %v822_v32, %v821_v30 }
 0x3fc   : > { %v814_v35 = vadd.f32 %v813_v33, %v812_v31  ;;  %v824_v36 = vrot.slane %v823_v34, 2 }
 0x3fe   : > { %v815_v37 = vrot.slane %v814_v35, 1  ;;  %v825_v38 = vadd.f32 %v824_v36, %v823_v34 }
 0x400   : > { %v816_v39 = vadd.f32 %v815_v37, %v814_v35  ;;  %v826_v40 = vrot.slane %v825_v38, 1 }
 0x402   : > { %v828_v41 = vmul.f32 0.00048828125, %v816_v39  ;;  %v827_v43 = vadd.f32 %v826_v40, %v825_v38 }
 0x404   : > { %v829_v44 = vmul.f32 0.00048828125, %v827_v43  ;;  %v830_v45 = vmul.f32 %v828_v41, %v828_v41  ;;  %v833_v51 = vsub.f32 %v798_v24, %v828_v41  ;;  %v834_v52 = vsub.f32 %v803_v22, %v828_v41 }
 0x406   : > { %v831_v46 = vsub.f32 %v829_v44, %v830_v45 }
 0x408   : > { %v832_v47 = vmax.f32 %v831_v46, 0.0 }
 0x40a   : > { %v835_v49 = vadd.f32 1e-05, %v832_v47 }
 0x40c   : > { %1168 = vrsqrt.f32 %v835_v49 }
 0x419   : > { %v1169_v53 = vpop.eup %1168 }
 0x41a   : > { %v837_v55 = vmul.f32 %v1169_v53, %v833_v51  ;;  %v838_v56 = vmul.f32 %v1169_v53, %v834_v52 }
 0x41c   : > { %v845_v58 = vmul.f32 %v984_v54, %v837_v55  ;;  %v846_v61 = vmul.f32 %v984_v54, %v838_v56 }
 0x41e   : > { %v853_v62 = vadd.f32 %v985_v57, %v845_v58  ;;  %v854_v59 = vadd.f32 %v985_v57, %v846_v61 }
 0x420   : > { %855 = vst [vmem:[%s325_s14] sm:$0xff] %v853_v62  ;;  %856 = vst [vmem:[%s325_s14 + $0x8] sm:$0xff] %v854_v59 }
 0x421   : > { %1263 = shalt.err (!%p1260_p3)
}
 0x422   : > { %s1264_s19 = scalar_lea.hbm %s1644_s9, 256  ;;  %s1268_s14 = scalar_lea.hbm %s1696_s7, 512 }
 0x423   : > { %p1265_p11 = scmp.ne.s32.totalorder %s1644_s9, %s1264_s19  ;;  %p1269_p4 = scmp.lt.s32.totalorder %s1644_s9, %s1696_s7 }
 0x424   : > { %p1270_p6 = scmp.lt.s32.totalorder %s1268_s14, %s1264_s19 }
 0x425   : > { %p1266_p9 = pnand %p1265_p11, %p1721_p2 }
 0x426   : > { %p1271_p8 = por %p1270_p6, %p1269_p4 }
 0x427   : > { %p1267_p1 = pneg %p1266_p9 }
 0x429   : > { %p1272_p5 = pnand %p1271_p8, %p1267_p1 }
 0x42b   : > { %1275 = shalt.err (!%p1272_p5)
}
 0x42c   : > { %s1329_s10 = smov 128   ;;  %s1330_s30 = smov 8  }
 0x42d   : > { %1094 = dma.vmem_to_hbm [thread:$0]  (%p1721_p2), %s1646_s16, 256, %s1644_s9, %s858_s28, %s1329_s10, %s1329_s10, %s1330_s30  }
 0x42e PF: > { %s886_s1 = sand.u32 1, %s1306_s24   ;;  %p1722_p7 = scmp.ne.s32.totalorder %s1705_s8, 0 }
 0x42f   : > { %p1723_p12 = scmp.ge.s32.totalorder %s1318_s27, 2  ;;  %s887_s20 = scalar_lea.sflag [#allocation4], %s886_s1 }
 0x431   : > { %p1108_p13 = pnand %p1723_p12, %p1722_p7 }
 0x433   : > { %p1109_p0 = pneg %p1108_p13 }
 0x435   : > { %1301 = dma.done.wait (%p1109_p0), %s887_s20, 256  }
 0x436   : > { %1303 = vsyncadd (%p1109_p0), %s887_s20, 4294967040  ;;  %p21_p10 = scmp.ge.s32.totalorder %s1449_s23, 4   ;;  %s1724_s24 = smov %s1310_s25 }
 0x437   : > { %s1725_s25 = smov %s1314_s26  ;;  %s1726_s26 = smov %s1465_s12 }
 0x438   : > { %s1727_s27 = smov %s1449_s23  ;;  %23 = sbr.rel (!%p21_p10) target bundleno = 8 (0x8), region = 101 }
 0x43d   :  { %892 = vsyncpa [#allocation3], 1 }
 0x43e   :  { %894 = vsyncpa [#allocation3 + $0x1], 1 }
 0x43f   :  { %895 = vsyncpa [#allocation6], 1 }
 0x440   :  { %896 = vsyncpa [#allocation4], 1 }
 0x441   :  { %898 = vsyncpa [#allocation4 + $0x1], 1 }

// kernel: tpu_custom_call.1
= control target key start
LH: loop header
LB: loop body
LE: loop exit
PB: predicated region body
PF: predicated region fallthrough
CT: control target
= control target key end

     0   :  { %s1689_s0 = inlined_call_operand.hbm [shape: f32[2,16,64], index: 0, kind: input, shape index: {}]   ;;  %s1690_s1 = inlined_call_operand.hbm [shape: f32[192,128], index: 1, kind: input, shape index: {}]   ;;  %s1691_s2 = inlined_call_operand.vmem [shape: f32[1,128], index: 2, kind: input, shape index: {}]   ;;  %s1692_s3 = inlined_call_operand.vmem [shape: f32[1,128], index: 3, kind: input, shape index: {}]   ;;  %s1693_s4 = inlined_call_operand.hbm [shape: f32[384,128], index: 4, kind: input, shape index: {}]   ;;  %s1694_s5 = inlined_call_operand.vmem [shape: f32[1,128], index: 5, kind: input, shape index: {}]   ;;  %s1695_s6 = inlined_call_operand.vmem [shape: f32[1,128], index: 6, kind: input, shape index: {}]   ;;  %s1696_s7 = inlined_call_operand.hbm [shape: f32[2,16,128], index: 7, kind: output, shape index: {}]  }
   0x1   :  { %1703 = sst [smem:[#allocation12_spill]] %s1690_s1 }
   0x2   :  { %12 = vsyncpa [#allocation3], 0 }
   0x3   :  { %14 = vsyncpa [#allocation3 + $0x1], 0 }
   0x4   :  { %15 = vsyncpa [#allocation6], 0 }
   0x5   :  { %16 = vsyncpa [#allocation4], 0 }
   0x6   :  { %18 = vsyncpa [#allocation4 + $0x1], 0  ;;  %s1371_s24 = smov 0   ;;  %s1373_s25 = smov 0  }
   0x7   :  { %s1375_s26 = smov 0   ;;  %s1377_s27 = smov 0  }
   0x8 LB: > { %s1392_s28 = sadd.s32 4294967295, %s1318_s27   ;;  %s963_s29 = sadd.s32 4294967294, %s1318_s27   ;;  %s1318_s27 = sphi %s1377_s27, %s1727_s27   ;;  %s1314_s26 = sphi %s1375_s26, %s1726_s26   ;;  %s1310_s25 = sphi %s1373_s25, %s1725_s25   ;;  %s1306_s24 = sphi %s1371_s24, %s1724_s24  }
   0x9   : > { %p44_p0 = scmp.ne.s32.totalorder %s1310_s25, %s1306_s24  ;;  %p1698_p1 = scmp.eq.s32.totalorder %s1392_s28, 0 }
   0xa   : > { %p194_p2 = scmp.eq.s32.totalorder %s1392_s28, 1  ;;  %p200_p3 = scmp.eq.s32.totalorder %s963_s29, 1 }
   0xb   : > { %p1401_p4 = por %p1698_p1, %p44_p0  ;;  %p964_p5 = scmp.ge.s32.totalorder %s1318_s27, 1 }
   0xc   : > { %p1406_p6 = por %p200_p3, %p44_p0  ;;  %p207_p7 = scmp.lt.s32.totalorder %s1318_s27, 3 }
   0xd   : > { %s1704_s30 = scalar_select %p1401_p4, 1, 0 }
   0xe   : > { %s1705_s8 = scalar_select %p1406_p6, 1, 0 }
   0xf   : > { %p1411_p8 = pnand %p964_p5, %p207_p7  ;;  %s1320_s10 = smov [#allocation5]  }
  0x10   : > { %s219_s11 = sshll.u32 %s1320_s10, 4  ;;  %s1321_s13 = smov [#allocation7]   ;;  %s220_s11 = int_to_ptr.vmem [resolvable:$true] %s219_s11 }
  0x11   : > { %s1706_s9 = scalar_select %p1411_p8, 1, 0 }
  0x12   : > { %p1096_p9 = pneg %p1411_p8  ;;  %s238_s14 = sshll.u32 %s1321_s13, 4  ;;  %s239_s14 = int_to_ptr.vmem [resolvable:$true] %s238_s14 }
  0x13   : > { %s1181_s15 = scalar_lea.vmem %s220_s11, 3072  ;;  %p1189_p5 = scmp.lt.s32.totalorder %s220_s11, %s220_s11 }
  0x14   : > { %p1420_p11 = pnand %p1096_p9, %p1698_p1  ;;  %p1182_p13 = scmp.ne.s32.totalorder %s220_s11, %s1181_s15 }
  0x15   : > { %p1190_p7 = scmp.lt.s32.totalorder %s1181_s15, %s1181_s15 }
  0x16   : > { %p1172_p12 = pneg %p1420_p11 }
  0x17   : > { %p1191_p10 = por %p1190_p7, %p1189_p5 }
  0x18   : > { %p1184_p0 = pnand %p1182_p13, %p1172_p12 }
  0x1a   : > { %p1185_p3 = pneg %p1184_p0 }
  0x1c   : > { %p1192_p9 = pnand %p1191_p10, %p1185_p3 }
  0x1e   : > { %1195 = shalt.err (!%p1192_p9)
}
  0x1f   : > { %s1697_s16 = smov 128   ;;  %s1699_s17 = smov 8  }
  0x20   : > { %s1708_s1 = sld [smem:[#allocation12_spill]]  ;;  %s1207_s20 = scalar_lea.vmem %s239_s14, 6144 }
  0x21   : > { %p1208_p13 = scmp.ne.s32.totalorder %s239_s14, %s1207_s20  ;;  %p1215_p10 = scmp.lt.s32.totalorder %s239_s14, %s239_s14 }
  0x22   : > { %p1216_p3 = scmp.lt.s32.totalorder %s1207_s20, %s1207_s20 }
  0x23   : > { %p1210_p0 = pnand %p1208_p13, %p1172_p12 }
  0x24   : > { %p1217_p7 = por %p1216_p3, %p1215_p10 }
  0x25   : > { %p1211_p5 = pneg %p1210_p0 }
  0x26   : > { %1099 = dma.hbm_to_vmem [thread:$0]  (!%p1420_p11), %s1708_s1, 3072, %s220_s11, [#allocation6], %s1697_s16, %s1697_s16, %s1699_s17  }
  0x27   : > { %p1218_p9 = pnand %p1217_p7, %p1211_p5 }
  0x29   : > { %1221 = shalt.err (!%p1218_p9)
}
  0x2a   : > { %1102 = dma.hbm_to_vmem [thread:$0]  (!%p1420_p11), %s1693_s4, 6144, %s239_s14, [#allocation6], %s1697_s16, %s1697_s16, %s1699_s17  }
  0x2b   : > { %s1449_s23 = sadd.s32 1, %s1318_s27   ;;  %s31_s29 = sadd.s32 1, %s1314_s26 }
  0x2c   : > { %s28_s10 = ssub.s32 %s1318_s27, %s1449_s23  ;;  %p38_p12 = scmp.ne.s32.totalorder %s1314_s26, %s1310_s25 }
  0x2d   : > { %p29_p13 = scmp.eq.s32.totalorder %s28_s10, 0  ;;  %p39_p0 = scmp.eq.s32.totalorder %s1318_s27, 0 }
  0x2e   : > { %p1459_p5 = por %p194_p2, %p38_p12  ;;  %p1113_p10 = scmp.lt.s32.totalorder %s1318_s27, 2 }
  0x2f   : > { %s1465_s12 = scalar_select %p29_p13, %s1314_s26, %s31_s29  }
  0x30   : > { %s1709_s11 = scalar_select %p1459_p5, 1, 0 }
  0x31   : > { %p40_p3 = por %p39_p0, %p38_p12  ;;  %s258_s13 = sand.u32 1, %s1314_s26  }
  0x32   : > { %s968_s15 = sshll.u32 %s258_s13, 4  ;;  %s991_s14 = sshll.u32 %s1318_s27, 8 }
  0x33   : > { %s1472_s20 = scalar_lea.hbm %s1689_s0, %s991_s14  ;;  %s262_s21 = scalar_lea.vmem [#allocation2], %s968_s15 }
  0x34   : > { %s269_s22 = sshll.u32 %s262_s21, 4  ;;  %p1476_p2 = pnand %p1113_p10, %p40_p3  ;;  %s1474_s22 = int_to_ptr.vmem [resolvable:$true] %s269_s22 }
  0x35   : > { %s1480_s29 = scalar_lea.sflag [#allocation3], %s258_s13  ;;  %s1222_s16 = scalar_lea.hbm %s1472_s20, 256 }
  0x36   : > { %p1223_p11 = scmp.ne.s32.totalorder %s1472_s20, %s1222_s16  ;;  %p1224_p7 = pneg %p1476_p2 }
  0x37   : > { %s1227_s15 = scalar_lea.hbm %s1689_s0, 512  ;;  %p1228_p13 = scmp.lt.s32.totalorder %s1472_s20, %s1689_s0 }
  0x38   : > { %p1225_p9 = pnand %p1224_p7, %p1223_p11  ;;  %p1229_p0 = scmp.lt.s32.totalorder %s1227_s15, %s1222_s16 }
  0x3a   : > { %p1226_p12 = pneg %p1225_p9  ;;  %p1230_p10 = por %p1229_p0, %p1228_p13 }
  0x3c   : > { %p1231_p3 = pnand %p1230_p10, %p1226_p12 }
  0x3e   : > { %1234 = shalt.err (!%p1231_p3)
}
  0x3f   : > { %s1235_s13 = scalar_lea.vmem %s1474_s22, 256  ;;  %s1324_s17 = smov [#allocation2]  }
  0x40   : > { %p1236_p1 = scmp.ne.s32.totalorder %s1474_s22, %s1235_s13  ;;  %s1240_s1 = sshll.u32 %s1324_s17, 4  ;;  %s1241_s1 = int_to_ptr.vmem [resolvable:$false] %s1240_s1 }
  0x41   : > { %s1242_s14 = scalar_lea.vmem %s1241_s1, 512  ;;  %p1243_p9 = scmp.lt.s32.totalorder %s1474_s22, %s1241_s1 }
  0x42   : > { %p1238_p6 = pnand %p1236_p1, %p1224_p7  ;;  %p1244_p5 = scmp.lt.s32.totalorder %s1242_s14, %s1235_s13 }
  0x44   : > { %p1239_p11 = pneg %p1238_p6  ;;  %p1245_p4 = por %p1244_p5, %p1243_p9 }
  0x46   : > { %p1246_p8 = pnand %p1245_p4, %p1239_p11 }
  0x48   : > { %1249 = shalt.err (!%p1246_p8)
}
  0x49   : > { %s1711_s16 = smov 8   ;;  %s1712_s18 = smov 128  }
  0x4a   : > { %1106 = dma.hbm_to_vmem [thread:$0]  (!%p1476_p2), %s1472_s20, 256, %s1474_s22, %s1480_s29, %s1712_s18, %s1712_s18, %s1711_s16  }
  0x4b   : > { %p1713_p1 = scmp.ne.s32.totalorder %s1706_s9, 0 }
  0x4c   : > { %s1507_s17 = sand.u32 (!%p1713_p1), 1, %s1310_s25   ;;  %p1714_p4 = scmp.ne.s32.totalorder (!%p1713_p1), %s1704_s30, 0 }
  0x4d   : > { %281 = sbr.rel (%p1713_p1) target bundleno = 1070 (0x42e), region = 48  ;;  %s972_s1 = sshll.u32 (!%p1713_p1), %s1507_s17, 4 }
  0x4e   : > { %s284_s15 = scalar_lea.sflag (!%p1713_p1), [#allocation3], %s1507_s17  ;;  %s287_s10 = scalar_lea.vmem (!%p1713_p1), [#allocation2], %s972_s1 }
  0x52   : > { %1293 = dma.done.wait (%p1714_p4), %s284_s15, 256  }
  0x53   : > { %1295 = vsyncadd (%p1714_p4), %s284_s15, 4294967040  ;;  %p1715_p6 = scmp.eq.s32.totalorder %s1392_s28, 0 }
  0x55   : > { %1297 = dma.done.wait (%p1715_p6), [#allocation6], 9216   ;;  %p1716_p8 = pmov %p1715_p6 }
  0x56   : > { %v330_v0 = vlaneseq  ;;  %v1325_v1 = vmov 0.0   ;;  %v326_v5 = vld [vmem:[%s287_s10] sm:$0xff]  ;;  %v327_v6 = vld [vmem:[%s287_s10 + $0x8] sm:$0xff]  ;;  %vm381_vm1 = vcmask 523264   ;;  %s1326_s30 = smov 64   ;;  %s992_s13 = sshll.u32 %s1392_s28, 8 }
  0x57   : > { %1299 = vsyncadd (%p1716_p8), [#allocation6], 4294958080  ;;  %414 = vmatprep.subr.mxu0 %v1325_v1  ;;  %v399_v7 = vld [vmem:[#allocation5 + $0x78] sm:$0xff]  ;;  %375 = vrot.lane.b32.xlu0 %v326_v5, %s1326_s30  ;;  %v328_v8 = vrot.slane %v326_v5, 7  ;;  %v335_v9 = vrot.slane %v326_v5, 1  ;;  %v329_v10 = vrot.slane %v327_v6, 7  ;;  %s1644_s9 = scalar_lea.hbm %s1696_s7, %s992_s13 }
  0x58   : > { %v1522_v2 = vshrl.u32 %v330_v0, 7  ;;  %v336_v11 = vrot.slane %v327_v6, 1  ;;  %415 = vmatpush1.msra.mxu0 %v399_v7  ;;  %v398_v12 = vld [vmem:[#allocation5 + $0x70] sm:$0xff]  ;;  %v397_v13 = vld [vmem:[#allocation5 + $0x68] sm:$0xff]  ;;  %v396_v19 = vld [vmem:[#allocation5 + $0x60] sm:$0xff]  ;;  %s325_s14 = scalar_lea.vmem [#allocation8], %s972_s1 }
  0x59   : > { %416 = vmatprep.subr.mxu0 %v1325_v1  ;;  %v395_v21 = vld [vmem:[#allocation5 + $0x58] sm:$0xff]  ;;  %v394_v22 = vld [vmem:[#allocation5 + $0x50] sm:$0xff]  ;;  %v393_v23 = vld [vmem:[#allocation5 + $0x48] sm:$0xff]  ;;  %s871_s16 = sshll.u32 %s325_s14, 4  ;;  %s858_s28 = scalar_lea.sflag [#allocation4], %s1507_s17  ;;  %s1646_s16 = int_to_ptr.vmem [resolvable:$true] %s871_s16 }
  0x5a   : > { %v340_v3 = vadd.s32 8, %v1522_v2  ;;  %vm337_vm0 = vcmp.lt.s32.totalorder %v1522_v2, 7  ;;  %vm332_vm2 = vcmp.lt.s32.totalorder %v1522_v2, 1  ;;  %417 = vmatpush1.msra.mxu0 %v398_v12  ;;  %v392_v24 = vld [vmem:[#allocation5 + $0x40] sm:$0xff]  ;;  %v391_v25 = vld [vmem:[#allocation5 + $0x38] sm:$0xff]  ;;  %v390_v26 = vld [vmem:[#allocation5 + $0x30] sm:$0xff] }
  0x5b   : > { %v338_v15 = vsel %vm337_vm0, %v335_v9, %v336_v11  ;;  %v1536_v16 = vsel %vm332_vm2, %v329_v10, %v328_v8  ;;  %v1540_v17 = vsel %vm337_vm0, %v336_v11, %v335_v9  ;;  %v1544_v18 = vsel %vm332_vm2, %v328_v8, %v329_v10  ;;  %418 = vmatprep.subr.mxu0 %v1325_v1  ;;  %v389_v27 = vld [vmem:[#allocation5 + $0x28] sm:$0xff]  ;;  %v388_v28 = vld [vmem:[#allocation5 + $0x20] sm:$0xff]  ;;  %v387_v29 = vld [vmem:[#allocation5 + $0x18] sm:$0xff]  ;;  %s1250_s1 = scalar_lea.vmem %s1646_s16, 256  ;;  %p1721_p2 = scmp.ne.s32.totalorder %s1709_s11, 0 }
  0x5c   : > { %v352_v4 = vand.u32 15, %v340_v3  ;;  %976 = vmatprep.mubr.msk.f32.mxu0 %vm381_vm1, %v338_v15  ;;  %377 = vrot.lane.b32.xlu0 %v327_v6, %s1326_s30  ;;  %v386_v30 = vld [vmem:[#allocation5 + $0x10] sm:$0xff]  ;;  %v385_v31 = vld [vmem:[#allocation5 + $0x8] sm:$0xff]  ;;  %v384_v32 = vld [vmem:[#allocation5] sm:$0xff]  ;;  %v345_v41 = vand.u32 15, %v1522_v2  ;;  %p1251_p5 = scmp.ne.s32.totalorder %s1646_s16, %s1250_s1  ;;  %s1328_s20 = smov [#allocation8]  }
  0x5d   : > { %419 = vmatpush1.msra.mxu0 %v397_v13  ;;  %v407_v33 = vld [vmem:[#allocation5 + $0xb8] sm:$0xff]  ;;  %v406_v34 = vld [vmem:[#allocation5 + $0xb0] sm:$0xff]  ;;  %v405_v35 = vld [vmem:[#allocation5 + $0xa8] sm:$0xff]  ;;  %s1254_s22 = sshll.u32 %s1328_s20, 4  ;;  %s1255_s22 = int_to_ptr.vmem [resolvable:$false] %s1254_s22 }
  0x5e   : > { %vm1528_vm3 = vcmp.eq.s32.totalorder %v352_v4, 15  ;;  %420 = vmatprep.subr.mxu0 %v1325_v1  ;;  %v404_v36 = vld [vmem:[#allocation5 + $0xa0] sm:$0xff]  ;;  %v403_v37 = vld [vmem:[#allocation5 + $0x98] sm:$0xff]  ;;  %v402_v38 = vld [vmem:[#allocation5 + $0x90] sm:$0xff]  ;;  %vm1573_vm4 = vcmp.eq.s32.totalorder %v345_v41, 0  ;;  %p1252_p7 = pnand %p1251_p5, %p1721_p2  ;;  %s1256_s29 = scalar_lea.vmem %s1255_s22, 512 }
  0x5f   : > { %v372_v20 = vsel %vm1528_vm3, 0.0, %v1540_v17  ;;  %421 = vmatpush1.msra.mxu0 %v396_v19  ;;  %v401_v39 = vld [vmem:[#allocation5 + $0x88] sm:$0xff]  ;;  %v400_v40 = vld [vmem:[#allocation5 + $0x80] sm:$0xff]  ;;  %v367_v43 = vsel %vm1573_vm4, 0.0, %v1536_v16  ;;  %v639_v56 = vld [vmem:[#allocation7 + $0xf8] sm:$0xff]  ;;  %p1257_p13 = scmp.lt.s32.totalorder %s1646_s16, %s1255_s22  ;;  %p1258_p0 = scmp.lt.s32.totalorder %s1256_s29, %s1250_s1 }
  0x60   : > { %422 = vmatprep.subr.mxu0 %v1325_v1  ;;  %v623_v57 = vld [vmem:[#allocation7 + $0x78] sm:$0xff]  ;;  %v638_v58 = vld [vmem:[#allocation7 + $0xf0] sm:$0xff]  ;;  %993 = vmatprep.subr.mxu1 %v639_v56  ;;  %v637_v60 = vld [vmem:[#allocation7 + $0xe8] sm:$0xff]  ;;  %p1253_p12 = pneg %p1252_p7 }
  0x61   : > { %423 = vmatpush1.msra.mxu0 %v395_v21  ;;  %v622_v59 = vld [vmem:[#allocation7 + $0x70] sm:$0xff]  ;;  %994 = vmatpush3.msra.mxu1 %v623_v57  ;;  %v621_v61 = vld [vmem:[#allocation7 + $0x68] sm:$0xff]  ;;  %v636_v62 = vld [vmem:[#allocation7 + $0xe0] sm:$0xff]  ;;  %p1259_p10 = por %p1258_p0, %p1257_p13 }
  0x62   : > { %424 = vmatprep.subr.mxu0 %v1325_v1  ;;  %995 = vmatprep.subr.mxu1 %v638_v58  ;;  %v620_v63 = vld [vmem:[#allocation7 + $0x60] sm:$0xff]  ;;  %v635_v0 = vld [vmem:[#allocation7 + $0xd8] sm:$0xff]  ;;  %v634_v3 = vld [vmem:[#allocation7 + $0xd0] sm:$0xff] }
  0x63   : > { %425 = vmatpush1.msra.mxu0 %v394_v22  ;;  %996 = vmatpush3.msra.mxu1 %v622_v59  ;;  %v618_v4 = vld [vmem:[#allocation7 + $0x50] sm:$0xff]  ;;  %v633_v5 = vld [vmem:[#allocation7 + $0xc8] sm:$0xff]  ;;  %v632_v7 = vld [vmem:[#allocation7 + $0xc0] sm:$0xff]  ;;  %p1260_p3 = pnand %p1259_p10, %p1253_p12 }
  0x64   : > { %426 = vmatprep.subr.mxu0 %v1325_v1  ;;  %997 = vmatprep.subr.mxu1 %v637_v60  ;;  %v617_v6 = vld [vmem:[#allocation7 + $0x48] sm:$0xff]  ;;  %v616_v8 = vld [vmem:[#allocation7 + $0x40] sm:$0xff]  ;;  %v631_v9 = vld [vmem:[#allocation7 + $0xb8] sm:$0xff] }
  0x65   : > { %427 = vmatpush1.msra.mxu0 %v393_v23  ;;  %998 = vmatpush3.msra.mxu1 %v621_v61  ;;  %v615_v10 = vld [vmem:[#allocation7 + $0x38] sm:$0xff]  ;;  %v630_v11 = vld [vmem:[#allocation7 + $0xb0] sm:$0xff]  ;;  %v629_v13 = vld [vmem:[#allocation7 + $0xa8] sm:$0xff] }
  0x66   : > { %428 = vmatprep.subr.mxu0 %v1325_v1  ;;  %999 = vmatprep.subr.mxu1 %v636_v62  ;;  %v614_v12 = vld [vmem:[#allocation7 + $0x30] sm:$0xff]  ;;  %v613_v15 = vld [vmem:[#allocation7 + $0x28] sm:$0xff]  ;;  %v628_v16 = vld [vmem:[#allocation7 + $0xa0] sm:$0xff] }
  0x67   : > { %429 = vmatpush1.msra.mxu0 %v392_v24  ;;  %1000 = vmatpush3.msra.mxu1 %v620_v63  ;;  %v612_v17 = vld [vmem:[#allocation7 + $0x20] sm:$0xff]  ;;  %v611_v19 = vld [vmem:[#allocation7 + $0x18] sm:$0xff]  ;;  %v610_v21 = vld [vmem:[#allocation7 + $0x10] sm:$0xff] }
  0x68   : > { %430 = vmatprep.subr.mxu0 %v1325_v1  ;;  %1001 = vmatprep.subr.mxu1 %v635_v0  ;;  %v625_v22 = vld [vmem:[#allocation7 + $0x88] sm:$0xff]  ;;  %v624_v24 = vld [vmem:[#allocation7 + $0x80] sm:$0xff]  ;;  %vm980_vm7 = vmneg %vm1573_vm4 }
  0x69   : > { %431 = vmatpush1.msra.mxu0 %v391_v25  ;;  %v609_v23 = vld [vmem:[#allocation7 + $0x8] sm:$0xff]  ;;  %v608_v25 = vld [vmem:[#allocation7] sm:$0xff]  ;;  %vm982_vm8 = vmneg %vm1528_vm3 }
  0x6a   : > { %432 = vmatprep.subr.mxu0 %v1325_v1  ;;  %v979_v56 = vld [vmem:[%s1692_s3] ss:$0 sm:$0xff] }
  0x6b   : > { %433 = vmatpush1.msra.mxu0 %v390_v26  ;;  %v1598_v26 = vld [vmem:[#allocation7 + $0x178] sm:$0xff] }
  0x6c   : > { %434 = vmatprep.subr.mxu0 %v1325_v1 }
  0x6d   : > { %435 = vmatpush1.msra.mxu0 %v389_v27 }
  0x6e   : > { %436 = vmatprep.subr.mxu0 %v1325_v1 }
  0x6f   : > { %437 = vmatpush1.msra.mxu0 %v388_v28 }
  0x70   : > { %438 = vmatprep.subr.mxu0 %v1325_v1 }
  0x71   : > { %439 = vmatpush1.msra.mxu0 %v387_v29 }
  0x72   : > { %440 = vmatprep.subr.mxu0 %v1325_v1 }
  0x73   : > { %441 = vmatpush1.msra.mxu0 %v386_v30 }
  0x74   : > { %442 = vmatprep.subr.mxu0 %v1325_v1 }
  0x75   : > { %443 = vmatpush1.msra.mxu0 %v385_v31 }
  0x76   : > { %444 = vmatprep.subr.mxu0 %v1325_v1 }
  0x77   : > { %445 = vmatpush1.msra.mxu0 %v384_v32 }
  0x78   : > { %462 = vmatprep.subr.mxu0 %v1325_v1 }
  0x79   : > { %463 = vmatpush2.msra.mxu0 %v407_v33 }
  0x7a   : > { %464 = vmatprep.subr.mxu0 %v1325_v1 }
  0x7b   : > { %465 = vmatpush2.msra.mxu0 %v406_v34 }
  0x7c   : > { %466 = vmatprep.subr.mxu0 %v1325_v1 }
  0x7d   : > { %467 = vmatpush2.msra.mxu0 %v405_v35 }
  0x7e   : > { %468 = vmatprep.subr.mxu0 %v1325_v1 }
  0x7f   : > { %469 = vmatpush2.msra.mxu0 %v404_v36 }
  0x80   : > { %470 = vmatprep.subr.mxu0 %v1325_v1 }
  0x81   : > { %471 = vmatpush2.msra.mxu0 %v403_v37 }
  0x82   : > { %472 = vmatprep.subr.mxu0 %v1325_v1 }
  0x83   : > { %473 = vmatpush2.msra.mxu0 %v402_v38 }
  0x84   : > { %474 = vmatprep.subr.mxu0 %v1325_v1 }
  0x85   : > { %475 = vmatpush2.msra.mxu0 %v401_v39 }
  0x86   : > { %476 = vmatprep.subr.mxu0 %v1325_v1  ;;  %v619_v1 = vld [vmem:[#allocation7 + $0x58] sm:$0xff] }
  0x87   : > { %477 = vmatpush2.msra.mxu0 %v400_v40  ;;  %1002 = vmatpush3.msra.mxu1 %v619_v1 }
  0x88   : > { %1003 = vmatprep.subr.mxu1 %v634_v3 }
  0x89   : > { %1004 = vmatpush3.msra.mxu1 %v618_v4 }
  0x8a   : > { %1005 = vmatprep.subr.mxu1 %v633_v5 }
  0x8b   : > { %1006 = vmatpush3.msra.mxu1 %v617_v6 }
  0x8c   : > { %1007 = vmatprep.subr.mxu1 %v632_v7 }
  0x8d   : > { %1008 = vmatpush3.msra.mxu1 %v616_v8 }
  0x8e   : > { %1009 = vmatprep.subr.mxu1 %v631_v9 }
  0x8f   : > { %1010 = vmatpush3.msra.mxu1 %v615_v10 }
  0x90   : > { %1011 = vmatprep.subr.mxu1 %v630_v11 }
  0x91   : > { %1012 = vmatpush3.msra.mxu1 %v614_v12 }
  0x92   : > { %1013 = vmatprep.subr.mxu1 %v629_v13 }
  0x93   : > { %1014 = vmatpush3.msra.mxu1 %v613_v15 }
  0x94   : > { %1015 = vmatprep.subr.mxu1 %v628_v16 }
  0x95   : > { %1016 = vmatpush3.msra.mxu1 %v612_v17 }
  0xc9   : > { %v376_v44 = vpop.permute.xlu0 %375 }
  0xca   : > { %v382_v45 = vsel %vm381_vm1, %v367_v43, %v376_v44 }
  0xcb   : > { %479 = vmatmul.mubr.f32.vlgmr.msra.gmra.mxu0 %v382_v45 }
  0xcc   : > { %977 = vmatprep.mubr.msk.f32.mxu0 %vm381_vm1, %v372_v20  ;;  %v626_v20 = vld [vmem:[#allocation7 + $0x90] sm:$0xff] }
  0xce   : > { %v378_v46 = vpop.permute.xlu0 %377 }
  0xcf   : > { %v383_v47 = vsel %vm381_vm1, %v1544_v18, %v378_v46  ;;  %v627_v18 = vld [vmem:[#allocation7 + $0x98] sm:$0xff] }
  0xd0   : > { %484 = vmatmul.mubr.f32.gmra.mxu0 %v383_v47  ;;  %1017 = vmatprep.subr.mxu1 %v627_v18 }
  0xd1   : > { %1018 = vmatpush3.msra.mxu1 %v611_v19 }
  0xd2   : > { %1019 = vmatprep.subr.mxu1 %v626_v20 }
  0xd3   : > { %1020 = vmatpush3.msra.mxu1 %v610_v21 }
  0xd4   : > { %1021 = vmatprep.subr.mxu1 %v625_v22 }
  0xd5   : > { %1022 = vmatpush3.msra.mxu1 %v609_v23 }
  0xd6   : > { %1023 = vmatprep.subr.mxu1 %v624_v24 }
  0xd7   : > { %1024 = vmatpush3.msra.mxu1 %v608_v25 }
  0xd8   : > { %1049 = vmatprep.subr.mxu1 %v1598_v26 }
 0x18b   : > { %v1588_v48 = vpop.f32.mrf.mxu0 }
 0x18c   : > { %v500_v54 = vmul.f32 %v1588_v48, %v1588_v48 }
 0x18d   : > { %v482_v49 = vpop.f32.mrf.mxu0 }
 0x190   : > { %v1590_v50 = vpop.f32.mrf.mxu0 }
 0x191   : > { %v491_v51 = vadd.f32 %v1590_v50, %v1588_v48  ;;  %v501_v52 = vmul.f32 %v1590_v50, %v1590_v50 }
 0x192   : > { %v487_v53 = vpop.f32.mrf.mxu0 }
 0x193   : > { %492 = vadd.xlane.f32.xlu1 %v491_v51  ;;  %v502_v55 = vadd.f32 %v501_v52, %v500_v54  ;;  %v978_v53 = vld [vmem:[%s1691_s2] ss:$0 sm:$0xff] }
 0x197   : > { %503 = vadd.xlane.f32.xlu1 %v502_v55 }
 0x21c   : > { %v493_v27 = vpop.xlane.xlu1 %492 }
 0x21d   : > { %v494_v28 = vrot.slane %v493_v27, 4 }
 0x21f   : > { %v495_v29 = vadd.f32 %v494_v28, %v493_v27 }
 0x220   : > { %v504_v30 = vpop.xlane.xlu1 %503 }
 0x221   : > { %v496_v31 = vrot.slane %v495_v29, 2  ;;  %v505_v32 = vrot.slane %v504_v30, 4 }
 0x223   : > { %v497_v33 = vadd.f32 %v496_v31, %v495_v29  ;;  %v506_v34 = vadd.f32 %v505_v32, %v504_v30 }
 0x225   : > { %v498_v35 = vrot.slane %v497_v33, 1  ;;  %v507_v36 = vrot.slane %v506_v34, 2 }
 0x227   : > { %v499_v37 = vadd.f32 %v498_v35, %v497_v33  ;;  %v508_v38 = vadd.f32 %v507_v36, %v506_v34 }
 0x229   : > { %v511_v39 = vmul.f32 0.00048828125, %v499_v37  ;;  %v509_v40 = vrot.slane %v508_v38, 1 }
 0x22b   : > { %v510_v41 = vadd.f32 %v509_v40, %v508_v38  ;;  %v513_v43 = vmul.f32 %v511_v39, %v511_v39  ;;  %v516_v49 = vsub.f32 %v1588_v48, %v511_v39  ;;  %v517_v51 = vsub.f32 %v1590_v50, %v511_v39 }
 0x22d   : > { %v512_v44 = vmul.f32 0.00048828125, %v510_v41 }
 0x22f   : > { %v514_v45 = vsub.f32 %v512_v44, %v513_v43  ;;  %v1327_v44 = vmov -1.0  }
 0x231   : > { %v515_v46 = vmax.f32 %v514_v45, 0.0 }
 0x233   : > { %v518_v47 = vadd.f32 1e-05, %v515_v46 }
 0x235   : > { %1158 = vrsqrt.f32 %v518_v47 }
 0x242   : > { %v1159_v52 = vpop.eup %1158 }
 0x243   : > { %v520_v54 = vmul.f32 %v1159_v52, %v516_v49  ;;  %v521_v55 = vmul.f32 %v1159_v52, %v517_v51 }
 0x245   : > { %v528_v57 = vmul.f32 %v978_v53, %v520_v54  ;;  %v529_v58 = vmul.f32 %v978_v53, %v521_v55 }
 0x247   : > { %v536_v59 = vadd.f32 %v979_v56, %v528_v57  ;;  %v537_v60 = vadd.f32 %v979_v56, %v529_v58 }
 0x249   : > { %v540_v61 = vmul.f32 0.70710677, %v536_v59  ;;  %v541_v62 = vmul.f32 0.70710677, %v537_v60  ;;  %v538_v52 = vmul.f32 0.5, %v536_v59  ;;  %v539_v54 = vmul.f32 0.5, %v537_v60 }
 0x24a   : > { %v654_v59 = vld [vmem:[#allocation7 + $0x170] sm:$0xff] }
 0x24b   : > { %v546_v48 = vand.u32 2147483647, %v540_v61  ;;  %v547_v63 = vand.u32 2147483647, %v541_v62  ;;  %vm542_vm5 = vcmp.ge.f32.partialorder %v540_v61, 0.0  ;;  %vm543_vm6 = vcmp.ge.f32.partialorder %v541_v62, 0.0 }
 0x24c   : > { %v544_v45 = vsel %vm542_vm5, 1.0, %v1327_v44  ;;  %v545_v47 = vsel %vm543_vm6, 1.0, %v1327_v44 }
 0x24d   : > { %v548_v50 = vmul.f32 0.3275911, %v546_v48  ;;  %v549_v0 = vmul.f32 0.3275911, %v547_v63  ;;  %v578_v4 = vsub.f32 0.0, %v546_v48  ;;  %v579_v6 = vsub.f32 0.0, %v547_v63 }
 0x24f   : > { %v550_v1 = vadd.f32 1.0, %v548_v50  ;;  %v551_v3 = vadd.f32 1.0, %v549_v0  ;;  %v580_v11 = vmul.f32 %v578_v4, %v546_v48  ;;  %v581_v13 = vmul.f32 %v579_v6, %v547_v63  ;;  %v653_v63 = vld [vmem:[#allocation7 + $0x168] sm:$0xff]  ;;  %v652_v50 = vld [vmem:[#allocation7 + $0x160] sm:$0xff]  ;;  %v646_v6 = vld [vmem:[#allocation7 + $0x130] sm:$0xff] }
 0x250   : > { %v648_v4 = vld [vmem:[#allocation7 + $0x140] sm:$0xff] }
 0x251   : > { %1160 = vrcp.f32 %v550_v1  ;;  %v582_v18 = vmul.f32 1.442695, %v580_v11  ;;  %v584_v20 = vmul.f32 1.442695, %v581_v13  ;;  %v641_v11 = vld [vmem:[#allocation7 + $0x108] sm:$0xff] }
 0x252   : > { %1162 = vrcp.f32 %v551_v3 }
 0x253   : > { %1164 = vpow2.f32 %v582_v18 }
 0x254   : > { %1166 = vpow2.f32 %v584_v20 }
 0x25e   : > { %v1161_v5 = vpop.eup %1160 }
 0x25f   : > { %v1163_v7 = vpop.eup %1162  ;;  %v554_v8 = vmul.f32 %v1161_v5, %v550_v1  ;;  %v651_v1 = vld [vmem:[#allocation7 + $0x158] sm:$0xff] }
 0x260   : > { %v555_v9 = vmul.f32 %v1163_v7, %v551_v3  ;;  %v1165_v37 = vpop.eup %1164  ;;  %v649_v3 = vld [vmem:[#allocation7 + $0x148] sm:$0xff] }
 0x261   : > { %v556_v10 = vsub.f32 2.0, %v554_v8  ;;  %v1167_v39 = vpop.eup %1166  ;;  %v644_v8 = vld [vmem:[#allocation7 + $0x120] sm:$0xff] }
 0x262   : > { %v557_v12 = vsub.f32 2.0, %v555_v9  ;;  %v643_v9 = vld [vmem:[#allocation7 + $0x118] sm:$0xff] }
 0x263   : > { %v558_v15 = vmul.f32 %v1161_v5, %v556_v10  ;;  %v647_v5 = vld [vmem:[#allocation7 + $0x138] sm:$0xff]  ;;  %v642_v10 = vld [vmem:[#allocation7 + $0x110] sm:$0xff] }
 0x264   : > { %v559_v16 = vmul.f32 %v1163_v7, %v557_v12  ;;  %v645_v7 = vld [vmem:[#allocation7 + $0x128] sm:$0xff]  ;;  %v640_v12 = vld [vmem:[#allocation7 + $0x100] sm:$0xff] }
 0x265   : > { %v560_v17 = vmul.f32 1.0614054, %v558_v15 }
 0x266   : > { %v561_v19 = vmul.f32 1.0614054, %v559_v16 }
 0x267   : > { %v562_v21 = vadd.f32 -1.4531521, %v560_v17 }
 0x268   : > { %v563_v22 = vadd.f32 -1.4531521, %v561_v19 }
 0x269   : > { %v564_v23 = vmul.f32 %v562_v21, %v558_v15 }
 0x26a   : > { %v565_v24 = vmul.f32 %v563_v22, %v559_v16 }
 0x26b   : > { %v566_v25 = vadd.f32 1.4214138, %v564_v23 }
 0x26c   : > { %v567_v27 = vadd.f32 1.4214138, %v565_v24 }
 0x26d   : > { %v568_v28 = vmul.f32 %v566_v25, %v558_v15 }
 0x26e   : > { %v569_v29 = vmul.f32 %v567_v27, %v559_v16 }
 0x26f   : > { %v570_v30 = vadd.f32 -0.28449672, %v568_v28 }
 0x270   : > { %v571_v31 = vadd.f32 -0.28449672, %v569_v29 }
 0x271   : > { %v572_v32 = vmul.f32 %v570_v30, %v558_v15 }
 0x272   : > { %v573_v33 = vmul.f32 %v571_v31, %v559_v16 }
 0x273   : > { %v574_v34 = vadd.f32 0.2548296, %v572_v32 }
 0x274   : > { %v575_v35 = vadd.f32 0.2548296, %v573_v33 }
 0x275   : > { %v576_v36 = vmul.f32 %v574_v34, %v558_v15 }
 0x276   : > { %v577_v38 = vmul.f32 %v575_v35, %v559_v16 }
 0x277   : > { %v586_v40 = vmul.f32 %v1165_v37, %v576_v36 }
 0x278   : > { %v587_v41 = vmul.f32 %v1167_v39, %v577_v38 }
 0x279   : > { %v588_v43 = vsub.f32 1.0, %v586_v40 }
 0x27a   : > { %v589_v46 = vsub.f32 1.0, %v587_v41 }
 0x27b   : > { %v590_v49 = vmul.f32 %v588_v43, %v544_v45 }
 0x27c   : > { %v591_v51 = vmul.f32 %v589_v46, %v545_v47 }
 0x27d   : > { %v592_v53 = vadd.f32 1.0, %v590_v49 }
 0x27e   : > { %v593_v55 = vadd.f32 1.0, %v591_v51 }
 0x27f   : > { %v1609_v56 = vmul.f32 %v592_v53, %v538_v52 }
 0x280   : > { %v1611_v57 = vmul.f32 %v593_v55, %v539_v54  ;;  %v984_v54 = vld [vmem:[%s1694_s5] ss:$0 sm:$0xff] }
 0x281   : > { %720 = vmatprep.mubr.f32.mxu1 %v1609_v56  ;;  %v596_v58 = vrot.slane %v1609_v56, 7  ;;  %v600_v60 = vrot.slane %v1609_v56, 1 }
 0x282   : > { %v597_v61 = vrot.slane %v1611_v57, 7  ;;  %v601_v48 = vrot.slane %v1611_v57, 1 }
 0x284   : > { %v599_v62 = vsel %vm332_vm2, %v597_v61, %v596_v58  ;;  %v598_v42 = vsel %vm332_vm2, %v596_v58, %v597_v61  ;;  %v602_v0 = vsel %vm337_vm0, %v600_v60, %v601_v48  ;;  %v603_v13 = vsel %vm337_vm0, %v601_v48, %v600_v60 }
 0x285   : > { %981 = vmatmul.mubr.msk.f32.vlgmr.msra.gmra.mxu1 %vm980_vm7, %v599_v62 }
 0x286   : > { %1050 = vmatpush3.msra.mxu1 %v1598_v26  ;;  %725 = vmatprep.mubr.f32.mxu1 %v1611_v57  ;;  %v650_v26 = vld [vmem:[#allocation7 + $0x150] sm:$0xff]  ;;  %v985_v57 = vld [vmem:[%s1695_s6] ss:$0 sm:$0xff] }
 0x287   : > { %1051 = vmatprep.subr.mxu1 %v654_v59 }
 0x288   : > { %1052 = vmatpush3.msra.mxu1 %v654_v59 }
 0x289   : > { %1053 = vmatprep.subr.mxu1 %v653_v63  ;;  %726 = vmatmul.mubr.f32.gmra.mxu1 %v598_v42 }
 0x28a   : > { %1054 = vmatpush3.msra.mxu1 %v653_v63  ;;  %1081 = vmatprep.mubr.f32.mxu1 %v602_v0 }
 0x28b   : > { %1055 = vmatprep.subr.mxu1 %v652_v50 }
 0x28c   : > { %1056 = vmatpush3.msra.mxu1 %v652_v50 }
 0x28d   : > { %1057 = vmatprep.subr.mxu1 %v651_v1 }
 0x28e   : > { %1058 = vmatpush3.msra.mxu1 %v651_v1 }
 0x28f   : > { %1059 = vmatprep.subr.mxu1 %v650_v26 }
 0x290   : > { %1060 = vmatpush3.msra.mxu1 %v650_v26 }
 0x291   : > { %1061 = vmatprep.subr.mxu1 %v649_v3 }
 0x292   : > { %1062 = vmatpush3.msra.mxu1 %v649_v3 }
 0x293   : > { %1063 = vmatprep.subr.mxu1 %v648_v4 }
 0x294   : > { %1064 = vmatpush3.msra.mxu1 %v648_v4 }
 0x295   : > { %1065 = vmatprep.subr.mxu1 %v647_v5 }
 0x296   : > { %1066 = vmatpush3.msra.mxu1 %v647_v5 }
 0x297   : > { %1067 = vmatprep.subr.mxu1 %v646_v6 }
 0x298   : > { %1068 = vmatpush3.msra.mxu1 %v646_v6 }
 0x299   : > { %1069 = vmatprep.subr.mxu1 %v645_v7 }
 0x29a   : > { %1070 = vmatpush3.msra.mxu1 %v645_v7 }
 0x29b   : > { %1071 = vmatprep.subr.mxu1 %v644_v8 }
 0x29c   : > { %1072 = vmatpush3.msra.mxu1 %v644_v8 }
 0x29d   : > { %1073 = vmatprep.subr.mxu1 %v643_v9 }
 0x29e   : > { %1074 = vmatpush3.msra.mxu1 %v643_v9 }
 0x29f   : > { %1075 = vmatprep.subr.mxu1 %v642_v10 }
 0x2a0   : > { %1076 = vmatpush3.msra.mxu1 %v642_v10 }
 0x2a1   : > { %1077 = vmatprep.subr.mxu1 %v641_v11 }
 0x2a2   : > { %1078 = vmatpush3.msra.mxu1 %v641_v11 }
 0x2a3   : > { %1079 = vmatprep.subr.mxu1 %v640_v12 }
 0x2a4   : > { %1080 = vmatpush3.msra.mxu1 %v640_v12 }
 0x2a5   : > { %1082 = vmatmul.mubr.msk.f32.vlgmr.msra.gmra.mxu1 %vm982_vm8, %v603_v13 }
 0x345   : > { %v1025_v15 = vpop.f32.mrf.mxu1 }
 0x347   : > { %v1026_v16 = vpop.f32.mrf.mxu1 }
 0x348   : > { %v1027_v21 = vadd.f32 %v1026_v16, %v1025_v15 }
 0x349   : > { %v1028_v17 = vpop.f32.mrf.mxu1 }
 0x34b   : > { %v1029_v18 = vpop.f32.mrf.mxu1 }
 0x34c   : > { %v1030_v19 = vadd.f32 %v1029_v18, %v1028_v17 }
 0x365   : > { %v1083_v20 = vpop.f32.mrf.mxu1 }
 0x366   : > { %v803_v22 = vadd.f32 %v1083_v20, %v1030_v19 }
 0x367   : > { %v797_v23 = vpop.f32.mrf.mxu1 }
 0x368   : > { %v798_v24 = vadd.f32 %v1027_v21, %v797_v23  ;;  %v818_v27 = vmul.f32 %v803_v22, %v803_v22 }
 0x36a   : > { %v808_v25 = vadd.f32 %v803_v22, %v798_v24  ;;  %v817_v14 = vmul.f32 %v798_v24, %v798_v24 }
 0x36c   : > { %809 = vadd.xlane.f32.xlu0 %v808_v25  ;;  %v819_v28 = vadd.f32 %v818_v27, %v817_v14 }
 0x36e   : > { %820 = vadd.xlane.f32.xlu1 %v819_v28 }
 0x3f5   : > { %v810_v29 = vpop.xlane.xlu0 %809 }
 0x3f6   : > { %v811_v2 = vrot.slane %v810_v29, 4 }
 0x3f7   : > { %v821_v30 = vpop.xlane.xlu1 %820 }
 0x3f8   : > { %v812_v31 = vadd.f32 %v811_v2, %v810_v29  ;;  %v822_v32 = vrot.slane %v821_v30, 4 }
 0x3fa   : > { %v813_v33 = vrot.slane %v812_v31, 2  ;;  %v823_v34 = vadd.f32 %v822_v32, %v821_v30 }
 0x3fc   : > { %v814_v35 = vadd.f32 %v813_v33, %v812_v31  ;;  %v824_v36 = vrot.slane %v823_v34, 2 }
 0x3fe   : > { %v815_v37 = vrot.slane %v814_v35, 1  ;;  %v825_v38 = vadd.f32 %v824_v36, %v823_v34 }
 0x400   : > { %v816_v39 = vadd.f32 %v815_v37, %v814_v35  ;;  %v826_v40 = vrot.slane %v825_v38, 1 }
 0x402   : > { %v828_v41 = vmul.f32 0.00048828125, %v816_v39  ;;  %v827_v43 = vadd.f32 %v826_v40, %v825_v38 }
 0x404   : > { %v829_v44 = vmul.f32 0.00048828125, %v827_v43  ;;  %v830_v45 = vmul.f32 %v828_v41, %v828_v41  ;;  %v833_v51 = vsub.f32 %v798_v24, %v828_v41  ;;  %v834_v52 = vsub.f32 %v803_v22, %v828_v41 }
 0x406   : > { %v831_v46 = vsub.f32 %v829_v44, %v830_v45 }
 0x408   : > { %v832_v47 = vmax.f32 %v831_v46, 0.0 }
 0x40a   : > { %v835_v49 = vadd.f32 1e-05, %v832_v47 }
 0x40c   : > { %1168 = vrsqrt.f32 %v835_v49 }
 0x419   : > { %v1169_v53 = vpop.eup %1168 }
 0x41a   : > { %v837_v55 = vmul.f32 %v1169_v53, %v833_v51  ;;  %v838_v56 = vmul.f32 %v1169_v53, %v834_v52 }
 0x41c   : > { %v845_v58 = vmul.f32 %v984_v54, %v837_v55  ;;  %v846_v61 = vmul.f32 %v984_v54, %v838_v56 }
 0x41e   : > { %v853_v62 = vadd.f32 %v985_v57, %v845_v58  ;;  %v854_v59 = vadd.f32 %v985_v57, %v846_v61 }
 0x420   : > { %855 = vst [vmem:[%s325_s14] sm:$0xff] %v853_v62  ;;  %856 = vst [vmem:[%s325_s14 + $0x8] sm:$0xff] %v854_v59 }
 0x421   : > { %1263 = shalt.err (!%p1260_p3)
}
 0x422   : > { %s1264_s19 = scalar_lea.hbm %s1644_s9, 256  ;;  %s1268_s14 = scalar_lea.hbm %s1696_s7, 512 }
 0x423   : > { %p1265_p11 = scmp.ne.s32.totalorder %s1644_s9, %s1264_s19  ;;  %p1269_p4 = scmp.lt.s32.totalorder %s1644_s9, %s1696_s7 }
 0x424   : > { %p1270_p6 = scmp.lt.s32.totalorder %s1268_s14, %s1264_s19 }
 0x425   : > { %p1266_p9 = pnand %p1265_p11, %p1721_p2 }
 0x426   : > { %p1271_p8 = por %p1270_p6, %p1269_p4 }
 0x427   : > { %p1267_p1 = pneg %p1266_p9 }
 0x429   : > { %p1272_p5 = pnand %p1271_p8, %p1267_p1 }
 0x42b   : > { %1275 = shalt.err (!%p1272_p5)
}
 0x42c   : > { %s1329_s10 = smov 128   ;;  %s1330_s30 = smov 8  }
 0x42d   : > { %1094 = dma.vmem_to_hbm [thread:$0]  (%p1721_p2), %s1646_s16, 256, %s1644_s9, %s858_s28, %s1329_s10, %s1329_s10, %s1330_s30  }
 0x42e PF: > { %s886_s1 = sand.u32 1, %s1306_s24   ;;  %p1722_p7 = scmp.ne.s32.totalorder %s1705_s8, 0 }
 0x42f   : > { %p1723_p12 = scmp.ge.s32.totalorder %s1318_s27, 2  ;;  %s887_s20 = scalar_lea.sflag [#allocation4], %s886_s1 }
 0x431   : > { %p1108_p13 = pnand %p1723_p12, %p1722_p7 }
 0x433   : > { %p1109_p0 = pneg %p1108_p13 }
 0x435   : > { %1301 = dma.done.wait (%p1109_p0), %s887_s20, 256  }
 0x436   : > { %1303 = vsyncadd (%p1109_p0), %s887_s20, 4294967040  ;;  %p21_p10 = scmp.ge.s32.totalorder %s1449_s23, 4   ;;  %s1724_s24 = smov %s1310_s25 }
 0x437   : > { %s1725_s25 = smov %s1314_s26  ;;  %s1726_s26 = smov %s1465_s12 }
 0x438   : > { %s1727_s27 = smov %s1449_s23  ;;  %23 = sbr.rel (!%p21_p10) target bundleno = 8 (0x8), region = 101 }
 0x43d   :  { %892 = vsyncpa [#allocation3], 1 }
 0x43e   :  { %894 = vsyncpa [#allocation3 + $0x1], 1 }
 0x43f   :  { %895 = vsyncpa [#allocation6], 1 }
 0x440   :  { %896 = vsyncpa [#allocation4], 1 }
 0x441   :  { %898 = vsyncpa [#allocation4 + $0x1], 1 }

</bundles_post_ra>
